<compile_context>
chip_gen: v6e
topology: v6e:2x2x1
jax: 0.10.0
libtpu: 0.0.40
codegen_flags: <defaults>
</compile_context>

<pallas_src>
import functools

import jax
import jax.numpy as jnp
from jax import lax
from jax.experimental import pallas as pl
from jax.experimental.pallas import tpu as pltpu

_PADL = 8  # sublane-aligned left offset of the data inside each padded scratch row


def _cdiv(a, b):
    return -(-a // b)


def _vmem_capacity_bytes():
    try:
        info = pltpu.get_tpu_info()
        for name in ("vmem_capacity_bytes", "vmem_bytes", "vmem_size_bytes"):
            v = getattr(info, name, None)
            if v:
                return int(v)
    except Exception:
        pass
    return 64 * 1024 * 1024  # conservative fallback (v7x per-TensorCore VMEM)


def _pick_tile_h(H, N, W, Wp, C, O, in_isz, out_isz, vmem_block_budget):
    """Largest tile height fitting the VMEM budget, with enough grid steps for
    megacore, preferring an exact divisor of H (avoids padding H)."""
    per_row = (2 * W * C * in_isz        # input tile block (double-buffered)
               + 4 * Wp * C * in_isz     # flat padded scratch + staging copies
               + 4 * Wp * O              # f32 chained-dot accumulator value
               + 2 * W * O * out_isz)    # output block (double-buffered)
    fixed = (4 * W * C * in_isz          # two 1-row halo blocks (double-buffered)
             + 2 * 9 * C * O * in_isz    # weights (double-buffered)
             + 64 * Wp * C * in_isz)     # slack for compiler temporaries
    cap = max(1, (vmem_block_budget - fixed) // max(per_row, 1))
    cap = int(min(cap, 256, H))
    # keep >= ~4 parallel grid steps so both v7x TensorCores get work at small N
    while N * _cdiv(H, cap) < 4 and cap > 8:
        cap = _cdiv(cap, 2)
    # prefer an exact divisor of H close to the cap (no H padding needed)
    best = 1
    for d in range(1, cap + 1):
        if H % d == 0:
            best = d
    return best if best * 4 >= cap * 3 else cap


def _conv3x3_kernel(x_top_ref, x_mid_ref, x_bot_ref, w_ref, o_ref, xp_ref, *,
                    wp, padl):
    # x_top_ref: (1, 1, W, C)   row above this tile (zeroed when i == 0)
    # x_mid_ref: (1, TH, W, C)  this tile's rows
    # x_bot_ref: (1, 1, W, C)   row below this tile (zeroed when i == last)
    # w_ref:     (9, C, O)      weights, tap-major (kh*3 + kw)
    # o_ref:     (1, TH, W, O)
    # xp_ref:    ((TH+2)*wp + 16, C)  flat zero-padded tile; padded row r lives
    #            at flat rows [r*wp, (r+1)*wp), data at columns [padl, padl+W).
    th = x_mid_ref.shape[1]
    wd = x_mid_ref.shape[2]
    cin = x_mid_ref.shape[3]
    cout = o_ref.shape[3]
    dt = x_mid_ref.dtype
    pr = wp - padl - wd  # right zero columns (>= 1)

    i = pl.program_id(1)
    last = pl.num_programs(1) - 1

    # ---- assemble the zero-padded tile in the flat VMEM scratch ------------
    # Every flat row in [0, (th+2)*wp) is rewritten each grid step (data and
    # pad columns together), so nothing stale survives and no full-scratch
    # zeroing is needed.
    zrow_l = jnp.zeros((padl, cin), dt)
    zrow_r = jnp.zeros((pr, cin), dt)

    top = jnp.where(i > 0, x_top_ref[0, 0], jnp.zeros((wd, cin), dt))
    xp_ref[pl.ds(0, wp), :] = jnp.concatenate([zrow_l, top, zrow_r], axis=0)

    mid = x_mid_ref[0]  # (th, wd, cin)
    padded_mid = jnp.concatenate(
        [jnp.zeros((th, padl, cin), dt), mid, jnp.zeros((th, pr, cin), dt)],
        axis=1).reshape(th * wp, cin)
    xp_ref[pl.ds(wp, th * wp), :] = padded_mid

    bot = jnp.where(i < last, x_bot_ref[0, 0], jnp.zeros((wd, cin), dt))
    xp_ref[pl.ds((th + 1) * wp, wp), :] = jnp.concatenate(
        [zrow_l, bot, zrow_r], axis=0)

    # ---- 3x3 conv: 9 zero-copy shifted views -> chained MXU matmuls --------
    # f32 accumulation stays in the matmul result path (no VMEM accumulator
    # read-modify-write).  Junk pad rows of each view land in junk output rows
    # that are sliced off below.
    acc = None
    for kh in range(3):
        for kw in range(3):
            base = kh * wp + padl + kw - 1  # static offset
            lhs = xp_ref[pl.ds(base, th * wp), :]  # (th*wp, cin) window
            part = jnp.dot(lhs, w_ref[kh * 3 + kw],
                           preferred_element_type=jnp.float32)
            acc = part if acc is None else acc + part

    out = acc.reshape(th, wp, cout)[:, :wd, :]
    o_ref[0, :, :, :] = out.astype(o_ref.dtype)


def conv3x3_pallas(x_nchw, weight_oihw, *, compute_dtype=jnp.bfloat16):
    """3x3 conv, padding=1, stride=1, no bias. x: (N,C,H,W), w: (O,C,3,3) -> NHWC (N,H,W,O)."""
    N, C, H, W = x_nchw.shape
    O = weight_oihw.shape[0]
    out_dtype = x_nchw.dtype
    in_isz = jnp.dtype(compute_dtype).itemsize
    out_isz = jnp.dtype(out_dtype).itemsize

    # padded row width: 8 aligned zero columns on the left, >=1 zero column on
    # the right, rounded so every padded row is a whole number of sublanes.
    wp = _PADL + _cdiv(W + 1, 8) * 8

    vmem_cap = _vmem_capacity_bytes()
    block_budget = min(int(vmem_cap * 0.30), 48 * 1024 * 1024)
    vmem_limit = min(int(vmem_cap * 0.75), 100 * 1024 * 1024)

    th = _pick_tile_h(H, N, W, wp, C, O, in_isz, out_isz, block_budget)
    hp = _cdiv(H, th) * th

    # NCHW -> NHWC + bf16 cast (+ optional H zero-pad) -- one fused XLA pass.
    x_nhwc = jnp.transpose(x_nchw, (0, 2, 3, 1)).astype(compute_dtype)
    if hp != H:
        x_nhwc = jnp.pad(x_nhwc, ((0, 0), (0, hp - H), (0, 0), (0, 0)))
    # (O, I, 3, 3) -> (3, 3, I, O) -> (9, I, O), tap-major.
    w_taps = jnp.transpose(weight_oihw, (2, 3, 1, 0)).reshape(9, C, O).astype(compute_dtype)

    grid = (N, hp // th)
    kernel = functools.partial(_conv3x3_kernel, wp=wp, padl=_PADL)

    conv_nhwc = pl.pallas_call(
        kernel,
        out_shape=jax.ShapeDtypeStruct((N, hp, W, O), out_dtype),
        grid_spec=pltpu.PrefetchScalarGridSpec(
            num_scalar_prefetch=0,
            grid=grid,
            in_specs=[
                # halo row above the tile (clamped at the border, zeroed in-kernel)
                pl.BlockSpec((1, 1, W, C),
                             lambda n, i: (n, jnp.maximum(i * th - 1, 0), 0, 0)),
                # the tile itself
                pl.BlockSpec((1, th, W, C), lambda n, i: (n, i, 0, 0)),
                # halo row below the tile (clamped at the border, zeroed in-kernel)
                pl.BlockSpec((1, 1, W, C),
                             lambda n, i: (n, jnp.minimum((i + 1) * th, hp - 1), 0, 0)),
                # full weight tensor (constant block index -> no re-DMA per step)
                pl.BlockSpec((9, C, O), lambda n, i: (0, 0, 0)),
            ],
            out_specs=pl.BlockSpec((1, th, W, O), lambda n, i: (n, i, 0, 0)),
            scratch_shapes=[
                pltpu.VMEM(((th + 2) * wp + 16, C), compute_dtype),  # flat padded tile
            ],
        ),
        compiler_params=pltpu.CompilerParams(
            dimension_semantics=("parallel", "parallel"),
            vmem_limit_bytes=int(vmem_limit)),
    )(x_nhwc, x_nhwc, x_nhwc, w_taps)

    if hp != H:
        conv_nhwc = conv_nhwc[:, :H]
    return conv_nhwc


def upsample(x_nchw, weight_oihw, *, compute_dtype=jnp.bfloat16):
    """Forward pass of UpSample: Conv2d(C -> 2C, 3x3, pad=1, no bias) + PixelShuffle(2)."""
    N, C, H, W = x_nchw.shape
    conv_nhwc = conv3x3_pallas(x_nchw, weight_oihw, compute_dtype=compute_dtype)  # (N,H,W,2C)
    O = conv_nhwc.shape[-1]
    c_out = O // 4
    # PixelShuffle(2) + NHWC->NCHW folded into a single transpose/copy pass.
    y = conv_nhwc.reshape(N, H, W, c_out, 2, 2)   # (n, h, w, c, i, j)
    y = jnp.transpose(y, (0, 3, 1, 4, 2, 5))      # (n, c, h, i, w, j)
    return y.reshape(N, c_out, 2 * H, 2 * W)


def _reference_upsample(x_nchw, weight_oihw, compute_dtype=jnp.bfloat16):
    # Same bf16 input rounding as the kernel path, f32 math -> tight comparison.
    xc = x_nchw.astype(compute_dtype).astype(jnp.float32)
    wc = weight_oihw.astype(compute_dtype).astype(jnp.float32)
    conv = lax.conv_general_dilated(
        xc, wc, window_strides=(1, 1), padding=((1, 1), (1, 1)),
        dimension_numbers=("NCHW", "OIHW", "NCHW"),
        precision=lax.Precision.HIGHEST).astype(x_nchw.dtype)
    N, O, H, W = conv.shape
    c_out = O // 4
    y = conv.reshape(N, c_out, 2, 2, H, W)
    y = jnp.transpose(y, (0, 1, 4, 2, 5, 3))
    return y.reshape(N, c_out, 2 * H, 2 * W)


if __name__ == "__main__":
    # Small deterministic example consistent with the module:
    # batch=2, channels=4, spatial=16  ->  output (2, 2, 32, 32)
    N, C, H, W = 2, 4, 16, 16
    key = jax.random.PRNGKey(0)
    k_x, k_w = jax.random.split(key)
    x = jax.random.normal(k_x, (N, C, H, W), dtype=jnp.float32)
    # Conv2d(channels, channels * 2, 3, padding=1, bias=False) weights: (2C, C, 3, 3)
    weight = (jax.random.normal(k_w, (2 * C, C, 3, 3), dtype=jnp.float32)
              * (1.0 / (C * 9) ** 0.5))

    out = jax.block_until_ready(jax.jit(upsample)(x, weight))
    ref = jax.block_until_ready(_reference_upsample(x, weight))

    assert out.shape == (N, C // 2, 2 * H, 2 * W), out.shape
    max_err = float(jnp.max(jnp.abs(out - ref)))
    assert jnp.allclose(out, ref, atol=2e-3, rtol=2e-3), max_err

    print("KERNEL_OK")
</pallas_src>

<mosaic_0001>
module attributes {stable_mosaic.version = 11 : i64} {
  func.func @_conv3x3_kernel(%arg0: i32, %arg1: i32, %arg2: memref<1x1x16x4xbf16, #tpu.memory_space<vmem>>, %arg3: memref<1x8x16x4xbf16, #tpu.memory_space<vmem>>, %arg4: memref<1x1x16x4xbf16, #tpu.memory_space<vmem>>, %arg5: memref<9x4x8xbf16, #tpu.memory_space<vmem>>, %arg6: memref<1x8x16x8xf32, #tpu.memory_space<vmem>>, %arg7: memref<336x4xbf16, #tpu.memory_space<vmem>>) attributes {dimension_semantics = [#tpu.dimension_semantics<parallel>, #tpu.dimension_semantics<parallel>], iteration_bounds = array<i64: 2, 2>, scalar_prefetch = 0 : i64, scratch_operands = 1 : i64, tpu.core_type = #tpu.core_type<tc>, window_params = [{transform_indices = @transform_0, window_bounds = array<i64: 1, 1, 16, 4>}, {transform_indices = @transform_1, window_bounds = array<i64: 1, 8, 16, 4>}, {transform_indices = @transform_2, window_bounds = array<i64: 1, 1, 16, 4>}, {pipeline_mode = #tpu.pipeline_mode<synchronous>, transform_indices = @transform_3, window_bounds = array<i64: 9, 4, 8>}, {transform_indices = @transform_4, window_bounds = array<i64: 1, 8, 16, 8>}]} {
    %cst = arith.constant 0.000000e+00 : bf16
    %0 = vector.broadcast %cst : bf16 to vector<8x4xbf16>
    %cst_0 = arith.constant 0.000000e+00 : bf16
    %1 = vector.broadcast %cst_0 : bf16 to vector<8x4xbf16>
    %c0_i32 = arith.constant 0 : i32
    %2 = arith.cmpi sgt, %arg1, %c0_i32 : i32
    %c0 = arith.constant 0 : index
    %c0_1 = arith.constant 0 : index
    %c0_2 = arith.constant 0 : index
    %c0_3 = arith.constant 0 : index
    %3 = vector.load %arg2[%c0, %c0_1, %c0_2, %c0_3] : memref<1x1x16x4xbf16, #tpu.memory_space<vmem>>, vector<1x1x16x4xbf16>
    %4 = vector.shape_cast %3 : vector<1x1x16x4xbf16> to vector<16x4xbf16>
    %cst_4 = arith.constant 0.000000e+00 : bf16
    %5 = vector.broadcast %cst_4 : bf16 to vector<16x4xbf16>
    %6 = arith.select %2, %4, %5 : vector<16x4xbf16>
    %7 = tpu.concatenate %0, %6, %1 in 0 : vector<8x4xbf16>, vector<16x4xbf16>, vector<8x4xbf16> -> vector<32x4xbf16>
    %c0_5 = arith.constant 0 : index
    %c0_6 = arith.constant 0 : index
    %8 = vector.load %arg7[%c0_5, %c0_6] : memref<336x4xbf16, #tpu.memory_space<vmem>>, vector<32x4xbf16>
    tpu.vector_store %arg7[%c0_5, %c0_6], %7 {strides = array<i32>} : memref<336x4xbf16, #tpu.memory_space<vmem>>, vector<32x4xbf16>,
    %c0_7 = arith.constant 0 : index
    %c0_8 = arith.constant 0 : index
    %c0_9 = arith.constant 0 : index
    %c0_10 = arith.constant 0 : index
    %9 = vector.load %arg3[%c0_7, %c0_8, %c0_9, %c0_10] : memref<1x8x16x4xbf16, #tpu.memory_space<vmem>>, vector<1x8x16x4xbf16>
    %10 = vector.shape_cast %9 : vector<1x8x16x4xbf16> to vector<8x16x4xbf16>
    %cst_11 = arith.constant 0.000000e+00 : bf16
    %11 = vector.broadcast %cst_11 : bf16 to vector<8x8x4xbf16>
    %cst_12 = arith.constant 0.000000e+00 : bf16
    %12 = vector.broadcast %cst_12 : bf16 to vector<8x8x4xbf16>
    %13 = tpu.concatenate %11, %10, %12 in 1 : vector<8x8x4xbf16>, vector<8x16x4xbf16>, vector<8x8x4xbf16> -> vector<8x32x4xbf16>
    %14 = vector.shape_cast %13 : vector<8x32x4xbf16> to vector<256x4xbf16>
    %c32 = arith.constant 32 : index
    %c0_13 = arith.constant 0 : index
    %15 = vector.load %arg7[%c32, %c0_13] : memref<336x4xbf16, #tpu.memory_space<vmem>>, vector<256x4xbf16>
    tpu.vector_store %arg7[%c32, %c0_13], %14 {strides = array<i32>} : memref<336x4xbf16, #tpu.memory_space<vmem>>, vector<256x4xbf16>,
    %c1_i32 = arith.constant 1 : i32
    %16 = arith.cmpi slt, %arg1, %c1_i32 : i32
    %c0_14 = arith.constant 0 : index
    %c0_15 = arith.constant 0 : index
    %c0_16 = arith.constant 0 : index
    %c0_17 = arith.constant 0 : index
    %17 = vector.load %arg4[%c0_14, %c0_15, %c0_16, %c0_17] : memref<1x1x16x4xbf16, #tpu.memory_space<vmem>>, vector<1x1x16x4xbf16>
    %18 = vector.shape_cast %17 : vector<1x1x16x4xbf16> to vector<16x4xbf16>
    %cst_18 = arith.constant 0.000000e+00 : bf16
    %19 = vector.broadcast %cst_18 : bf16 to vector<16x4xbf16>
    %20 = arith.select %16, %18, %19 : vector<16x4xbf16>
    %21 = tpu.concatenate %0, %20, %1 in 0 : vector<8x4xbf16>, vector<16x4xbf16>, vector<8x4xbf16> -> vector<32x4xbf16>
    %c288 = arith.constant 288 : index
    %c0_19 = arith.constant 0 : index
    %22 = vector.load %arg7[%c288, %c0_19] : memref<336x4xbf16, #tpu.memory_space<vmem>>, vector<32x4xbf16>
    tpu.vector_store %arg7[%c288, %c0_19], %21 {strides = array<i32>} : memref<336x4xbf16, #tpu.memory_space<vmem>>, vector<32x4xbf16>,
    %c7 = arith.constant 7 : index
    %c0_20 = arith.constant 0 : index
    %23 = vector.load %arg7[%c7, %c0_20] : memref<336x4xbf16, #tpu.memory_space<vmem>>, vector<256x4xbf16>
    %c0_21 = arith.constant 0 : index
    %c0_22 = arith.constant 0 : index
    %c0_23 = arith.constant 0 : index
    %24 = vector.load %arg5[%c0_21, %c0_22, %c0_23] : memref<9x4x8xbf16, #tpu.memory_space<vmem>>, vector<1x4x8xbf16>
    %25 = vector.shape_cast %24 : vector<1x4x8xbf16> to vector<4x8xbf16>
    %cst_24 = arith.constant dense<0.000000e+00> : vector<256x8xf32>
    %26 = tpu.matmul %23, %25, %cst_24 {dimension_numbers = #tpu.dot_dimension_numbers<[1], [0], [0], [1], [0, 0, 1, 1], [], []>} : vector<256x4xbf16>, vector<4x8xbf16>, vector<256x8xf32> -> vector<256x8xf32>
    %c8 = arith.constant 8 : index
    %c0_25 = arith.constant 0 : index
    %27 = vector.load %arg7[%c8, %c0_25] : memref<336x4xbf16, #tpu.memory_space<vmem>>, vector<256x4xbf16>
    %c1 = arith.constant 1 : index
    %c0_26 = arith.constant 0 : index
    %c0_27 = arith.constant 0 : index
    %28 = vector.load %arg5[%c1, %c0_26, %c0_27] : memref<9x4x8xbf16, #tpu.memory_space<vmem>>, vector<1x4x8xbf16>
    %29 = vector.shape_cast %28 : vector<1x4x8xbf16> to vector<4x8xbf16>
    %cst_28 = arith.constant dense<0.000000e+00> : vector<256x8xf32>
    %30 = tpu.matmul %27, %29, %cst_28 {dimension_numbers = #tpu.dot_dimension_numbers<[1], [0], [0], [1], [0, 0, 1, 1], [], []>} : vector<256x4xbf16>, vector<4x8xbf16>, vector<256x8xf32> -> vector<256x8xf32>
    %31 = arith.addf %26, %30 : vector<256x8xf32>
    %c9 = arith.constant 9 : index
    %c0_29 = arith.constant 0 : index
    %32 = vector.load %arg7[%c9, %c0_29] : memref<336x4xbf16, #tpu.memory_space<vmem>>, vector<256x4xbf16>
    %c2 = arith.constant 2 : index
    %c0_30 = arith.constant 0 : index
    %c0_31 = arith.constant 0 : index
    %33 = vector.load %arg5[%c2, %c0_30, %c0_31] : memref<9x4x8xbf16, #tpu.memory_space<vmem>>, vector<1x4x8xbf16>
    %34 = vector.shape_cast %33 : vector<1x4x8xbf16> to vector<4x8xbf16>
    %cst_32 = arith.constant dense<0.000000e+00> : vector<256x8xf32>
    %35 = tpu.matmul %32, %34, %cst_32 {dimension_numbers = #tpu.dot_dimension_numbers<[1], [0], [0], [1], [0, 0, 1, 1], [], []>} : vector<256x4xbf16>, vector<4x8xbf16>, vector<256x8xf32> -> vector<256x8xf32>
    %36 = arith.addf %31, %35 : vector<256x8xf32>
    %c39 = arith.constant 39 : index
    %c0_33 = arith.constant 0 : index
    %37 = vector.load %arg7[%c39, %c0_33] : memref<336x4xbf16, #tpu.memory_space<vmem>>, vector<256x4xbf16>
    %c3 = arith.constant 3 : index
    %c0_34 = arith.constant 0 : index
    %c0_35 = arith.constant 0 : index
    %38 = vector.load %arg5[%c3, %c0_34, %c0_35] : memref<9x4x8xbf16, #tpu.memory_space<vmem>>, vector<1x4x8xbf16>
    %39 = vector.shape_cast %38 : vector<1x4x8xbf16> to vector<4x8xbf16>
    %cst_36 = arith.constant dense<0.000000e+00> : vector<256x8xf32>
    %40 = tpu.matmul %37, %39, %cst_36 {dimension_numbers = #tpu.dot_dimension_numbers<[1], [0], [0], [1], [0, 0, 1, 1], [], []>} : vector<256x4xbf16>, vector<4x8xbf16>, vector<256x8xf32> -> vector<256x8xf32>
    %41 = arith.addf %36, %40 : vector<256x8xf32>
    %c40 = arith.constant 40 : index
    %c0_37 = arith.constant 0 : index
    %42 = vector.load %arg7[%c40, %c0_37] : memref<336x4xbf16, #tpu.memory_space<vmem>>, vector<256x4xbf16>
    %c4 = arith.constant 4 : index
    %c0_38 = arith.constant 0 : index
    %c0_39 = arith.constant 0 : index
    %43 = vector.load %arg5[%c4, %c0_38, %c0_39] : memref<9x4x8xbf16, #tpu.memory_space<vmem>>, vector<1x4x8xbf16>
    %44 = vector.shape_cast %43 : vector<1x4x8xbf16> to vector<4x8xbf16>
    %cst_40 = arith.constant dense<0.000000e+00> : vector<256x8xf32>
    %45 = tpu.matmul %42, %44, %cst_40 {dimension_numbers = #tpu.dot_dimension_numbers<[1], [0], [0], [1], [0, 0, 1, 1], [], []>} : vector<256x4xbf16>, vector<4x8xbf16>, vector<256x8xf32> -> vector<256x8xf32>
    %46 = arith.addf %41, %45 : vector<256x8xf32>
    %c41 = arith.constant 41 : index
    %c0_41 = arith.constant 0 : index
    %47 = vector.load %arg7[%c41, %c0_41] : memref<336x4xbf16, #tpu.memory_space<vmem>>, vector<256x4xbf16>
    %c5 = arith.constant 5 : index
    %c0_42 = arith.constant 0 : index
    %c0_43 = arith.constant 0 : index
    %48 = vector.load %arg5[%c5, %c0_42, %c0_43] : memref<9x4x8xbf16, #tpu.memory_space<vmem>>, vector<1x4x8xbf16>
    %49 = vector.shape_cast %48 : vector<1x4x8xbf16> to vector<4x8xbf16>
    %cst_44 = arith.constant dense<0.000000e+00> : vector<256x8xf32>
    %50 = tpu.matmul %47, %49, %cst_44 {dimension_numbers = #tpu.dot_dimension_numbers<[1], [0], [0], [1], [0, 0, 1, 1], [], []>} : vector<256x4xbf16>, vector<4x8xbf16>, vector<256x8xf32> -> vector<256x8xf32>
    %51 = arith.addf %46, %50 : vector<256x8xf32>
    %c71 = arith.constant 71 : index
    %c0_45 = arith.constant 0 : index
    %52 = vector.load %arg7[%c71, %c0_45] : memref<336x4xbf16, #tpu.memory_space<vmem>>, vector<256x4xbf16>
    %c6 = arith.constant 6 : index
    %c0_46 = arith.constant 0 : index
    %c0_47 = arith.constant 0 : index
    %53 = vector.load %arg5[%c6, %c0_46, %c0_47] : memref<9x4x8xbf16, #tpu.memory_space<vmem>>, vector<1x4x8xbf16>
    %54 = vector.shape_cast %53 : vector<1x4x8xbf16> to vector<4x8xbf16>
    %cst_48 = arith.constant dense<0.000000e+00> : vector<256x8xf32>
    %55 = tpu.matmul %52, %54, %cst_48 {dimension_numbers = #tpu.dot_dimension_numbers<[1], [0], [0], [1], [0, 0, 1, 1], [], []>} : vector<256x4xbf16>, vector<4x8xbf16>, vector<256x8xf32> -> vector<256x8xf32>
    %56 = arith.addf %51, %55 : vector<256x8xf32>
    %c72 = arith.constant 72 : index
    %c0_49 = arith.constant 0 : index
    %57 = vector.load %arg7[%c72, %c0_49] : memref<336x4xbf16, #tpu.memory_space<vmem>>, vector<256x4xbf16>
    %c7_50 = arith.constant 7 : index
    %c0_51 = arith.constant 0 : index
    %c0_52 = arith.constant 0 : index
    %58 = vector.load %arg5[%c7_50, %c0_51, %c0_52] : memref<9x4x8xbf16, #tpu.memory_space<vmem>>, vector<1x4x8xbf16>
    %59 = vector.shape_cast %58 : vector<1x4x8xbf16> to vector<4x8xbf16>
    %cst_53 = arith.constant dense<0.000000e+00> : vector<256x8xf32>
    %60 = tpu.matmul %57, %59, %cst_53 {dimension_numbers = #tpu.dot_dimension_numbers<[1], [0], [0], [1], [0, 0, 1, 1], [], []>} : vector<256x4xbf16>, vector<4x8xbf16>, vector<256x8xf32> -> vector<256x8xf32>
    %61 = arith.addf %56, %60 : vector<256x8xf32>
    %c73 = arith.constant 73 : index
    %c0_54 = arith.constant 0 : index
    %62 = vector.load %arg7[%c73, %c0_54] : memref<336x4xbf16, #tpu.memory_space<vmem>>, vector<256x4xbf16>
    %c8_55 = arith.constant 8 : index
    %c0_56 = arith.constant 0 : index
    %c0_57 = arith.constant 0 : index
    %63 = vector.load %arg5[%c8_55, %c0_56, %c0_57] : memref<9x4x8xbf16, #tpu.memory_space<vmem>>, vector<1x4x8xbf16>
    %64 = vector.shape_cast %63 : vector<1x4x8xbf16> to vector<4x8xbf16>
    %cst_58 = arith.constant dense<0.000000e+00> : vector<256x8xf32>
    %65 = tpu.matmul %62, %64, %cst_58 {dimension_numbers = #tpu.dot_dimension_numbers<[1], [0], [0], [1], [0, 0, 1, 1], [], []>} : vector<256x4xbf16>, vector<4x8xbf16>, vector<256x8xf32> -> vector<256x8xf32>
    %66 = arith.addf %61, %65 : vector<256x8xf32>
    %67 = vector.shape_cast %66 : vector<256x8xf32> to vector<8x32x8xf32>
    %68 = vector.extract_strided_slice %67 {offsets = [0, 0, 0], sizes = [8, 16, 8], strides = [1, 1, 1]} : vector<8x32x8xf32> to vector<8x16x8xf32>
    %c0_59 = arith.constant 0 : index
    %c0_60 = arith.constant 0 : index
    %c0_61 = arith.constant 0 : index
    %c0_62 = arith.constant 0 : index
    %69 = vector.load %arg6[%c0_59, %c0_60, %c0_61, %c0_62] : memref<1x8x16x8xf32, #tpu.memory_space<vmem>>, vector<1x8x16x8xf32>
    %70 = vector.shape_cast %69 : vector<1x8x16x8xf32> to vector<8x16x8xf32>
    %71 = vector.shape_cast %68 : vector<8x16x8xf32> to vector<1x8x16x8xf32>
    tpu.vector_store %arg6[%c0_59, %c0_60, %c0_61, %c0_62], %71 {strides = array<i32>} : memref<1x8x16x8xf32, #tpu.memory_space<vmem>>, vector<1x8x16x8xf32>,
    return
  }
  func.func @transform_0(%arg0: i32, %arg1: i32) -> (i32, i32, i32, i32) {
    %c8_i32 = arith.constant 8 : i32
    %0 = arith.muli %arg1, %c8_i32 : i32
    %c1_i32 = arith.constant 1 : i32
    %1 = arith.subi %0, %c1_i32 : i32
    %c0_i32 = arith.constant 0 : i32
    %2 = arith.maxsi %1, %c0_i32 : i32
    %c0_i32_0 = arith.constant 0 : i32
    %c0_i32_1 = arith.constant 0 : i32
    %c0_i32_2 = arith.constant 0 : i32
    return %arg0, %2, %c0_i32_0, %c0_i32_1 : i32, i32, i32, i32
  }
  func.func @transform_1(%arg0: i32, %arg1: i32) -> (i32, i32, i32, i32) {
    %c0_i32 = arith.constant 0 : i32
    %c0_i32_0 = arith.constant 0 : i32
    %c0_i32_1 = arith.constant 0 : i32
    return %arg0, %arg1, %c0_i32, %c0_i32_0 : i32, i32, i32, i32
  }
  func.func @transform_2(%arg0: i32, %arg1: i32) -> (i32, i32, i32, i32) {
    %c1_i32 = arith.constant 1 : i32
    %0 = arith.addi %arg1, %c1_i32 : i32
    %c8_i32 = arith.constant 8 : i32
    %1 = arith.muli %0, %c8_i32 : i32
    %c15_i32 = arith.constant 15 : i32
    %2 = arith.minsi %1, %c15_i32 : i32
    %c0_i32 = arith.constant 0 : i32
    %c0_i32_0 = arith.constant 0 : i32
    %c0_i32_1 = arith.constant 0 : i32
    return %arg0, %2, %c0_i32, %c0_i32_0 : i32, i32, i32, i32
  }
  func.func @transform_3(%arg0: i32, %arg1: i32) -> (i32, i32, i32) {
    %c0_i32 = arith.constant 0 : i32
    %c0_i32_0 = arith.constant 0 : i32
    %c0_i32_1 = arith.constant 0 : i32
    %c0_i32_2 = arith.constant 0 : i32
    return %c0_i32, %c0_i32_0, %c0_i32_1 : i32, i32, i32
  }
  func.func @transform_4(%arg0: i32, %arg1: i32) -> (i32, i32, i32, i32) {
    %c0_i32 = arith.constant 0 : i32
    %c0_i32_0 = arith.constant 0 : i32
    %c0_i32_1 = arith.constant 0 : i32
    return %arg0, %arg1, %c0_i32, %c0_i32_0 : i32, i32, i32, i32
  }
}

</mosaic_0001>

<bundles_post_ra>
// kernel: upsample.1
= control target key start
LH: loop header
LB: loop body
LE: loop exit
PB: predicated region body
PF: predicated region fallthrough
CT: control target
= control target key end

     0   :  { %s5455_s15 = smov 0   ;;  %s5457_s16 = smov 0   ;;  %s6620_s0 = inlined_call_operand.vmem [shape: bf16[2,16,16,4], index: 0, kind: input, shape index: {}, may-alias: {0,1,2}]   ;;  %s6621_s1 = inlined_call_operand.vmem [shape: bf16[2,16,16,4], index: 1, kind: input, shape index: {}, may-alias: {0,1,2}]   ;;  %s6622_s2 = inlined_call_operand.vmem [shape: bf16[2,16,16,4], index: 2, kind: input, shape index: {}, may-alias: {0,1,2}]   ;;  %s6623_s3 = inlined_call_operand.vmem [shape: bf16[9,4,8], index: 3, kind: input, shape index: {}]   ;;  %s6624_s4 = inlined_call_operand.vmem [shape: f32[2,16,16,8], index: 4, kind: output, shape index: {}]  }
   0x1   :  { %s5459_s17 = smov 0   ;;  %s5461_s18 = smov 0  }
   0x2   :  { %s5463_s19 = smov 0  }
   0x3 LB: > { %s23_s20 = sadd.s32 1, %s5420_s17  ;;  %s26_s21 = sadd.s32 1, %s5424_s18  ;;  %s5428_s19 = sphi %s5463_s19, %s14_s19   ;;  %s5424_s18 = sphi %s5461_s18, %s6633_s18   ;;  %s5420_s17 = sphi %s5459_s17, %s6632_s17   ;;  %s5416_s16 = sphi %s5457_s16, %s6631_s16   ;;  %s5412_s15 = sphi %s5455_s15, %s6630_s15  }
   0x4   : > { %p24_p0 = scmp.ge.s32.totalorder %s23_s20, 2  ;;  %p4343_p1 = scmp.ge.s32.totalorder %s5428_s19, 1 }
   0x5   : > { %p248_p2 = scmp.lt.s32.totalorder %s5428_s19, 5 }
   0x6   : > { %s6635_s20 = smov (%p24_p0, %s23_s20), 0  ;;  %s6637_s21 = smov (!%p24_p0, %s26_s21), %s5424_s18 }
   0x7   : > { %p249_p3 = pnand %p4343_p1, %p248_p2  ;;  %p28_p4 = scmp.ge.s32.totalorder %s6637_s21, 2 }
   0x8   : > { %s5491_s24 = sshll.u32 (!%p249_p3), %s5412_s15, 3  ;;  %p314_p5 = scmp.lt.s32.totalorder (!%p249_p3), %s5416_s16, 1 }
   0x9   : > { %s6639_s21 = smov (%p28_p4, %s6637_s21), 0  ;;  %252 = sbr.rel (%p249_p3) target bundleno = 534 (0x216), region = 36 }
   0xa   : > { %p330_p6 = scmp.lt.s32.totalorder (!%p249_p3), %s5491_s24, 15  ;;  %s4345_s5 = sadd.s32 (!%p249_p3), 4294967295, %s5491_s24 }
   0xb   : > { %p312_p7 = scmp.gt.s32.totalorder (!%p249_p3), %s4345_s5, 0  ;;  %p4346_p8 = scmp.lt.s32.totalorder (!%p249_p3), %s4345_s5, 15 }
   0xc   : > { %p367_p9 = scmp.gt.s32.totalorder (!%p249_p3), %s5412_s15, 0  ;;  %p646_p11 = scmp.lt.s32.totalorder (!%p249_p3), %s5412_s15, 1 }
   0xe   : > { %v4429_v0 = vld [vmem:[%s6623_s3 + $0x2] sm:$0x3]  ;;  %vm847_vm0 = vcmask 1041408   ;;  %v5500_v2 = vld [vmem:[%s6623_s3] sm:$0x3]  ;;  %s6641_s16 = smov (!%p314_p5, %s5416_s16), 1 }
   0xf   : > { %5203 = vmatprep.subr.msk.bf16.mxu1 %vm847_vm0, %v4429_v0  ;;  %v849_v1 = vsel %vm847_vm0, %v4429_v0, 0  ;;  %5202 = vmatprep.subr.msk.bf16.mxu0 %vm847_vm0, %v4429_v0  ;;  %v5505_v3 = vld [vmem:[%s6623_s3 + $0x4] sm:$0x3]  ;;  %s331_s29 = scalar_select %p330_p6, %s5491_s24, 15  ;;  %vm381_vm1 = vcmask 1043456   ;;  %vm401_vm2 = vcmask 27648  }
  0x10   : > { %5201 = vmatpush3.bf16.msra.mxu1 %v849_v1  ;;  %4895 = vmatpush3.bf16.msra.mxu0 %v849_v1  ;;  %s5512_s30 = sshll.u32 %s6641_s16, 5  ;;  %vm798_vm4 = vcmask 31744   ;;  %v1217_v62 = vsel %vm847_vm0, %v5500_v2, 0  ;;  %v5601_v0 = vld [vmem:[%s6623_s3 + $0x6] sm:$0x3]  ;;  %vm4175_vm8 = vcmask 64512  }
  0x11   : > { %5204 = vmatprep.subr.msk.bf16.mxu1 %vm847_vm0, %v5500_v2  ;;  %5205 = vmatprep.subr.msk.bf16.mxu0 %vm847_vm0, %v5505_v3  ;;  %s4355_s6 = sshll.u32 %s331_s29, 1  ;;  %vm1015_vm5 = vsmask.f32 4352  ;;  %vm1482_vm6 = vsmask.f32 7424 }
  0x12   : > { %s5516_s7 = sadd.s32 %s4355_s6, %s5512_s30 }
  0x13   : > { %s4357_s8 = sshll.u32 %s5516_s7, 2  ;;  %s4368_s28 = sshll.u32 %s5516_s7, 3 }
  0x14   : > { %s5522_s11 = scalar_lea.vmem %s6621_s1, %s4357_s8  ;;  %s6541_s6 = scalar_lea.vmem %s6624_s4, %s4368_s28 }
  0x15   : > { %v5252_v4 = vld [vmem:[%s5522_s11 + $0x14] ss:$0 sps:$4 sm:$0xff]   ;;  %v5253_v5 = vld [vmem:[%s5522_s11 + $0x18] ss:$0 sps:$4 sm:$0xff]   ;;  %v5254_v6 = vld [vmem:[%s5522_s11 + $0x1c] ss:$0 sps:$4 sm:$0xff]  }
  0x16   : > { %v5255_v7 = vld [vmem:[%s5522_s11 + $0x20] ss:$0 sps:$4 sm:$0xff]   ;;  %s313_s12 = scalar_select %p312_p7, %s4345_s5, 0  ;;  %v477_v8 = vsel %vm381_vm1, 0, %v5253_v5  ;;  %v491_v9 = vsel %vm381_vm1, %v5252_v4, 0  ;;  %v493_v11 = vsel %vm381_vm1, %v5254_v6, 0 }
  0x17   : > { %s370_s13 = scalar_select %p367_p9, 1, 0  ;;  %v479_v10 = vsel %vm381_vm1, 0, %v5255_v7  ;;  %v4401_v12 = vcombine.low %v491_v9, %v491_v9  ;;  %v4402_v13 = vcombine.high %v491_v9, %v491_v9  ;;  %v5263_v14 = vld [vmem:[%s5522_s11] ss:$0 sps:$4 sm:$0xff]   ;;  %v4403_v15 = vcombine.low %v477_v8, %v477_v8 }
  0x18   : > { %s6643_s12 = smov (!%p4346_p8, %s313_s12), 15  ;;  %v4404_v16 = vcombine.high %v477_v8, %v477_v8  ;;  %v4405_v17 = vcombine.low %v493_v11, %v493_v11  ;;  %v4406_v18 = vcombine.high %v493_v11, %v493_v11  ;;  %v5269_v19 = vld [vmem:[%s5522_s11 + $0x24] ss:$0 sps:$4 sm:$0xff]   ;;  %v4407_v20 = vcombine.low %v479_v10, %v479_v10  ;;  %v5270_v24 = vld [vmem:[%s5522_s11 + $0x28] ss:$0 sps:$4 sm:$0xff]  }
  0x19   : > { %v4408_v21 = vcombine.high %v479_v10, %v479_v10  ;;  %624 = vst.msk [vmem:[#allocation2 + $0x38] sm:$0xf] %vm401_vm2, %v4401_v12  ;;  %625 = vst.msk [vmem:[#allocation2 + $0x3c] sm:$0xf] %vm401_vm2, %v4402_v13  ;;  %s4351_s14 = sshll.u32 %s6643_s12, 1  ;;  %v371_v22 = vstv %s370_s13  ;;  %v471_v23 = vsel %vm381_vm1, 0, %v5263_v14 }
  0x1a   : > { %626 = vst.msk [vmem:[#allocation2 + $0x40] sm:$0xf] %vm401_vm2, %v4403_v15  ;;  %627 = vst.msk [vmem:[#allocation2 + $0x44] sm:$0xf] %vm401_vm2, %v4404_v16  ;;  %s320_s16 = sadd.s32 %s5512_s30, %s4351_s14  ;;  %vm5545_vm3 = vcmp.eq.s32.totalorder %v371_v22, 1  ;;  %v4391_v26 = vcombine.low %v471_v23, %v471_v23  ;;  %v4392_v27 = vcombine.high %v471_v23, %v471_v23  ;;  %v495_v28 = vsel %vm381_vm1, %v5269_v19, 0 }
  0x1b   : > { %628 = vst.msk [vmem:[#allocation2 + $0x48] sm:$0xf] %vm401_vm2, %v4405_v17  ;;  %629 = vst.msk [vmem:[#allocation2 + $0x4c] sm:$0xf] %vm401_vm2, %v4406_v18  ;;  %v5272_v29 = vld [vmem:[%s5522_s11 + $0x4] ss:$0 sps:$4 sm:$0xff]   ;;  %v4409_v30 = vcombine.low %v495_v28, %v495_v28  ;;  %v4410_v32 = vcombine.high %v495_v28, %v495_v28 }
  0x1c   : > { %630 = vst.msk [vmem:[#allocation2 + $0x50] sm:$0xf] %vm401_vm2, %v4407_v20  ;;  %631 = vst.msk [vmem:[#allocation2 + $0x54] sm:$0xf] %vm401_vm2, %v4408_v21  ;;  %s4353_s22 = sshll.u32 %s320_s16, 2  ;;  %v481_v31 = vsel %vm381_vm1, 0, %v5270_v24 }
  0x1d   : > { %v5273_v33 = vld [vmem:[%s5522_s11 + $0x8] ss:$0 sps:$4 sm:$0xff]   ;;  %s322_s26 = scalar_lea.vmem %s6620_s0, %s4353_s22  ;;  %614 = vst.msk [vmem:[#allocation2 + $0x10] sm:$0xf] %vm401_vm2, %v4391_v26  ;;  %615 = vst.msk [vmem:[#allocation2 + $0x14] sm:$0xf] %vm401_vm2, %v4392_v27  ;;  %v4411_v34 = vcombine.low %v481_v31, %v481_v31  ;;  %v4412_v37 = vcombine.high %v481_v31, %v481_v31 }
  0x1e   : > { %v487_v35 = vsel %vm381_vm1, %v5272_v29, 0  ;;  %v5275_v36 = vld [vmem:[%s5522_s11 + $0x2c] ss:$0 sps:$4 sm:$0xff]   ;;  %v368_v38 = vld [vmem:[%s322_s26] sm:$0xf]  ;;  %v473_v41 = vsel %vm381_vm1, 0, %v5273_v33 }
  0x1f   : > { %v369_v39 = vld [vmem:[%s322_s26 + $0x4] sm:$0xf]  ;;  %632 = vst.msk [vmem:[#allocation2 + $0x58] sm:$0xf] %vm401_vm2, %v4409_v30  ;;  %633 = vst.msk [vmem:[#allocation2 + $0x5c] sm:$0xf] %vm401_vm2, %v4410_v32  ;;  %v4393_v40 = vcombine.low %v487_v35, %v487_v35  ;;  %v4394_v42 = vcombine.high %v487_v35, %v487_v35  ;;  %v4395_v44 = vcombine.low %v473_v41, %v473_v41 }
  0x20   : > { %v373_v43 = vsel %vm5545_vm3, %v368_v38, 0  ;;  %634 = vst.msk [vmem:[#allocation2 + $0x60] sm:$0xf] %vm401_vm2, %v4411_v34  ;;  %v497_v45 = vsel %vm381_vm1, %v5275_v36, 0  ;;  %635 = vst.msk [vmem:[#allocation2 + $0x64] sm:$0xf] %vm401_vm2, %v4412_v37  ;;  %v4396_v52 = vcombine.high %v473_v41, %v473_v41 }
  0x21   : > { %v5277_v46 = vld [vmem:[%s5522_s11 + $0x30] ss:$0 sps:$4 sm:$0xff]   ;;  %v374_v47 = vsel %vm5545_vm3, %v369_v39, 0  ;;  %616 = vst.msk [vmem:[#allocation2 + $0x18] sm:$0xf] %vm401_vm2, %v4393_v40  ;;  %v4413_v48 = vcombine.low %v497_v45, %v497_v45  ;;  %v4414_v49 = vcombine.high %v497_v45, %v497_v45  ;;  %v4369_v50 = vcombine.low %v373_v43, %v373_v43  ;;  %s4740_s12 = sadd.s32 8, %s5491_s24 }
  0x22   : > { %617 = vst.msk [vmem:[#allocation2 + $0x1c] sm:$0xf] %vm401_vm2, %v4394_v42  ;;  %618 = vst.msk [vmem:[#allocation2 + $0x20] sm:$0xf] %vm401_vm2, %v4395_v44  ;;  %v483_v51 = vsel %vm381_vm1, 0, %v5277_v46  ;;  %v4370_v60 = vcombine.low %v374_v47, %v374_v47  ;;  %v1664_v34 = vsel %vm847_vm0, %v5505_v3, 0 }
  0x23   : > { %v5577_v53 = vld [vmem:[#allocation2 + $0x44] sm:$0xf]  ;;  %v5579_v54 = vld [vmem:[#allocation2 + $0x48] sm:$0xf]  ;;  %636 = vst.msk [vmem:[#allocation2 + $0x68] sm:$0xf] %vm401_vm2, %v4413_v48  ;;  %v4415_v55 = vcombine.low %v483_v51, %v483_v51  ;;  %v4416_v56 = vcombine.high %v483_v51, %v483_v51 }
  0x24   : > { %637 = vst.msk [vmem:[#allocation2 + $0x6c] sm:$0xf] %vm401_vm2, %v4414_v49  ;;  %v5583_v57 = vld [vmem:[#allocation2 + $0x4c] sm:$0xf]  ;;  %v5585_v58 = vld [vmem:[#allocation2 + $0x50] sm:$0xf]  ;;  %v4438_v59 = vcombine.low %v5577_v53, %v5579_v54 }
  0x25   : > { %619 = vst.msk [vmem:[#allocation2 + $0x24] sm:$0xf] %vm401_vm2, %v4396_v52  ;;  %v4439_v61 = vcombine.low %v5583_v57, %v5585_v58  ;;  %638 = vst.msk [vmem:[#allocation2 + $0x70] sm:$0xf] %vm401_vm2, %v4415_v55  ;;  %v384_v63 = vsel %vm381_vm1, 0, %v4369_v50  ;;  %v386_v2 = vsel %vm381_vm1, %v4370_v60, 0 }
  0x26   : > { %639 = vst.msk [vmem:[#allocation2 + $0x74] sm:$0xf] %vm401_vm2, %v4416_v56  ;;  %4912 = vmatprep.mubr.msk.bf16.mxu1 %vm798_vm4, %v4438_v59  ;;  %v5603_v1 = vld [vmem:[#allocation2 + $0x54] sm:$0xf]  ;;  %v5606_v4 = vld [vmem:[#allocation2 + $0x58] sm:$0xf]  ;;  %v4371_v5 = vcombine.low %v384_v63, %v384_v63  ;;  %v4372_v8 = vcombine.high %v384_v63, %v384_v63  ;;  %v4373_v9 = vcombine.low %v386_v2, %v386_v2 }
  0x27   : > { %4913 = vmatmul.mubr.msk.bf16.vlgmr.msra.gmra.mxu1 %vm798_vm4, %v4439_v61  ;;  %v5609_v6 = vld [vmem:[#allocation2 + $0x5c] sm:$0xf]  ;;  %v5611_v7 = vld [vmem:[#allocation2 + $0x60] sm:$0xf]  ;;  %v5279_v10 = vld [vmem:[%s5522_s11 + $0xc] ss:$0 sps:$4 sm:$0xff]   ;;  %v4374_v11 = vcombine.high %v386_v2, %v386_v2  ;;  %v4440_v12 = vcombine.low %v5603_v1, %v5606_v4 }
  0x28   : > { %4929 = vmatpush3.bf16.msra.mxu1 %v1217_v62  ;;  %402 = vst.msk [vmem:[#allocation2] sm:$0xf] %vm401_vm2, %v4371_v5  ;;  %v5619_v13 = vld [vmem:[#allocation2 + $0x64] sm:$0xf]  ;;  %403 = vst.msk [vmem:[#allocation2 + $0x4] sm:$0xf] %vm401_vm2, %v4372_v8  ;;  %v4441_v15 = vcombine.low %v5609_v6, %v5611_v7 }
  0x29   : > { %5206 = vmatprep.subr.msk.bf16.mxu1 %vm847_vm0, %v5601_v0  ;;  %404 = vst.msk [vmem:[#allocation2 + $0x8] sm:$0xf] %vm401_vm2, %v4373_v9  ;;  %v5281_v16 = vld [vmem:[%s5522_s11 + $0x10] ss:$0 sps:$4 sm:$0xff]   ;;  %405 = vst.msk [vmem:[#allocation2 + $0xc] sm:$0xf] %vm401_vm2, %v4374_v11  ;;  %4916 = vmatprep.mubr.msk.bf16.mxu1 %vm798_vm4, %v4440_v12 }
  0x2a   : > { %v5621_v14 = vld [vmem:[#allocation2 + $0x68] sm:$0xf]  ;;  %v489_v18 = vsel %vm381_vm1, %v5279_v10, 0  ;;  %v5283_v19 = vld [vmem:[%s5522_s11 + $0x34] ss:$0 sps:$4 sm:$0xff]   ;;  %v475_v23 = vsel %vm381_vm1, 0, %v5281_v16 }
  0x2b   : > { %v4442_v17 = vcombine.low %v5619_v13, %v5621_v14  ;;  %v687_v20 = vld [vmem:[#allocation2 + $0x14] sm:$0xf]  ;;  %v688_v21 = vld [vmem:[#allocation2 + $0x18] sm:$0xf]  ;;  %v4397_v22 = vcombine.low %v489_v18, %v489_v18  ;;  %v686_v24 = vld [vmem:[#allocation2 + $0x10] sm:$0xf]  ;;  %v4398_v26 = vcombine.high %v489_v18, %v489_v18  ;;  %v4399_v27 = vcombine.low %v475_v23, %v475_v23 }
  0x2c   : > { %v5636_v25 = vld [vmem:[#allocation2 + $0x6c] sm:$0xf]  ;;  %v499_v28 = vsel %vm381_vm1, %v5283_v19, 0  ;;  %v5285_v29 = vld [vmem:[%s5522_s11 + $0x38] ss:$0 sps:$4 sm:$0xff]   ;;  %v4400_v32 = vcombine.high %v475_v23, %v475_v23  ;;  %v4464_v44 = vcombine.low %v686_v24, %v687_v20  ;;  %v4432_v45 = vcombine.low %v687_v20, %v688_v21  ;;  %p5752_p10 = scmp.lt.s32.totalorder %s4740_s12, 15 }
  0x2d   : > { %620 = vst.msk [vmem:[#allocation2 + $0x28] sm:$0xf] %vm401_vm2, %v4397_v22  ;;  %v4417_v30 = vcombine.low %v499_v28, %v499_v28  ;;  %v4418_v31 = vcombine.high %v499_v28, %v499_v28  ;;  %v5644_v35 = vld [vmem:[#allocation2 + $0x1c] sm:$0xf]  ;;  %v5646_v36 = vld [vmem:[#allocation2 + $0x70] sm:$0xf] }
  0x2e   : > { %621 = vst.msk [vmem:[#allocation2 + $0x2c] sm:$0xf] %vm401_vm2, %v4398_v26  ;;  %622 = vst.msk [vmem:[#allocation2 + $0x30] sm:$0xf] %vm401_vm2, %v4399_v27  ;;  %v485_v37 = vsel %vm381_vm1, 0, %v5285_v29  ;;  %v4465_v48 = vcombine.low %v688_v21, %v5644_v35  ;;  %v4443_v49 = vcombine.low %v5636_v25, %v5646_v36  ;;  %v1034_v63 = vshrl.u32 %v4464_v44, 16 }
  0x2f   : > { %4917 = vmatmul.mubr.msk.bf16.gmra.mxu1 %vm798_vm4, %v4441_v15  ;;  %v682_v33 = vld [vmem:[#allocation2] sm:$0x8]  ;;  %v683_v38 = vld [vmem:[#allocation2 + $0x4] sm:$0xf]  ;;  %640 = vst.msk [vmem:[#allocation2 + $0x78] sm:$0xf] %vm401_vm2, %v4417_v30  ;;  %v4419_v40 = vcombine.low %v485_v37, %v485_v37  ;;  %v4420_v3 = vcombine.high %v485_v37, %v485_v37 }
  0x30   : > { %4920 = vmatprep.mubr.msk.bf16.mxu1 %vm798_vm4, %v4442_v17  ;;  %v684_v39 = vld [vmem:[#allocation2 + $0x8] sm:$0xf]  ;;  %641 = vst.msk [vmem:[#allocation2 + $0x7c] sm:$0xf] %vm401_vm2, %v4418_v31  ;;  %623 = vst.msk [vmem:[#allocation2 + $0x34] sm:$0xf] %vm401_vm2, %v4400_v32  ;;  %v4462_v43 = vcombine.low %v682_v33, %v683_v38 }
  0x31   : > { %v685_v41 = vld [vmem:[#allocation2 + $0xc] sm:$0xf]  ;;  %v4430_v42 = vcombine.low %v683_v38, %v684_v39  ;;  %642 = vst.msk [vmem:[#allocation2 + $0x80] sm:$0xf] %vm401_vm2, %v4419_v40  ;;  %v5661_v50 = vld [vmem:[%s6623_s3 + $0x8] sm:$0x3] }
  0x32   : > { %v4431_v46 = vcombine.low %v685_v41, %v686_v24  ;;  %v4463_v47 = vcombine.low %v684_v39, %v685_v41  ;;  %643 = vst.msk [vmem:[#allocation2 + $0x84] sm:$0xf] %vm401_vm2, %v4420_v3  ;;  %v1017_v51 = vshrl.u32 %v4462_v43, 16  ;;  %v1020_v52 = vshll.u32 %v4462_v43, 16  ;;  %v690_v55 = vld [vmem:[#allocation2 + $0x20] sm:$0xf] }
  0x33   : > { %4896 = vmatprep.mubr.msk.bf16.mxu0 %vm798_vm4, %v4430_v42  ;;  %v691_v60 = vld [vmem:[#allocation2 + $0x24] sm:$0xf]  ;;  %v5667_v2 = vld [vmem:[#allocation2 + $0x74] sm:$0xf]  ;;  %v1037_v9 = vshll.u32 %v4464_v44, 16  ;;  %v1043_v11 = vshrl.u32 %v4465_v48, 16  ;;  %v4433_v16 = vcombine.low %v5644_v35, %v690_v55 }
  0x34   : > { %v1025_v56 = vshrl.u32 %v4463_v47, 16  ;;  %v1028_v59 = vshll.u32 %v4463_v47, 16  ;;  %4897 = vmatmul.mubr.msk.bf16.vlgmr.msra.gmra.mxu0 %vm798_vm4, %v4431_v46  ;;  %v1019_v61 = vrot.slane %v1017_v51, 3  ;;  %v1022_v62 = vrot.slane %v1020_v52, 4  ;;  %v692_v10 = vld [vmem:[#allocation2 + $0x28] sm:$0xf] }
  0x35   : > { %4963 = vmatpush3.bf16.msra.mxu0 %v1664_v34  ;;  %4900 = vmatprep.mubr.msk.bf16.mxu0 %vm798_vm4, %v4432_v45  ;;  %v5288_v19 = vld [vmem:[#allocation2 + $0x4] sm:$0xff]   ;;  %v1046_v20 = vshll.u32 %v4465_v48, 16  ;;  %v1036_v21 = vrot.slane %v1034_v63, 3  ;;  %v4434_v22 = vcombine.low %v691_v60, %v692_v10  ;;  %v1039_v26 = vrot.slane %v1037_v9, 4  ;;  %v693_v27 = vld [vmem:[#allocation2 + $0x2c] sm:$0xf] }
  0x36   : > { %v1027_v5 = vrot.slane %v1025_v56, 3  ;;  %v1030_v8 = vrot.slane %v1028_v59, 4  ;;  %5207 = vmatprep.subr.msk.bf16.mxu0 %vm847_vm0, %v5661_v50  ;;  %v5672_v12 = vld [vmem:[#allocation2 + $0x78] sm:$0xf]  ;;  %v1023_v18 = vor.u32 %v1022_v62, %v1019_v61  ;;  %v1045_v29 = vrot.slane %v1043_v11, 3  ;;  %v5686_v34 = vld [vmem:[#allocation2 + $0xc] sm:$0xff]  }
  0x37   : > { %4921 = vmatmul.mubr.msk.bf16.gmra.mxu1 %vm798_vm4, %v4443_v49  ;;  %v5674_v15 = vld [vmem:[#allocation2 + $0x7c] sm:$0xf]  ;;  %v4444_v17 = vcombine.low %v5667_v2, %v5672_v12  ;;  %v4466_v30 = vcombine.low %v690_v55, %v691_v60  ;;  %v696_v31 = vld [vmem:[#allocation2 + $0x38] sm:$0xf]  ;;  %v4467_v32 = vcombine.low %v692_v10, %v693_v27  ;;  %v1486_v35 = vshll.u32 %v5288_v19, 16  ;;  %s6645_s12 = smov (!%p5752_p10, %s4740_s12), 15 }
  0x38   : > { %v5679_v23 = vld [vmem:[#allocation2 + $0x80] sm:$0xf]  ;;  %v1031_v24 = vor.u32 %v1030_v8, %v1027_v5  ;;  %v1048_v37 = vrot.slane %v1046_v20, 4  ;;  %v694_v38 = vld [vmem:[#allocation2 + $0x30] sm:$0xf]  ;;  %v1040_v40 = vor.u32 %v1039_v26, %v1036_v21  ;;  %v2146_v48 = vsel %vm847_vm0, %v5601_v0, 0 }
  0x39   : > { %4924 = vmatprep.mubr.msk.bf16.mxu1 %vm798_vm4, %v4444_v17  ;;  %v4445_v28 = vcombine.low %v5674_v15, %v5679_v23  ;;  %v695_v39 = vld [vmem:[#allocation2 + $0x34] sm:$0xf]  ;;  %v1052_v3 = vshrl.u32 %v4466_v30, 16  ;;  %v1055_v41 = vshll.u32 %v4466_v30, 16  ;;  %v4435_v42 = vcombine.low %v693_v27, %v694_v38  ;;  %v697_v46 = vld [vmem:[#allocation2 + $0x3c] sm:$0xf] }
  0x3a   : > { %v1032_v33 = vsel %vm1015_vm5, %v1023_v18, %v1031_v24  ;;  %v1049_v43 = vor.u32 %v1048_v37, %v1045_v29  ;;  %v1061_v44 = vshrl.u32 %v4467_v32, 16  ;;  %v1064_v45 = vshll.u32 %v4467_v32, 16  ;;  %v698_v55 = vld [vmem:[#allocation2 + $0x40] sm:$0xf]  ;;  %v5290_v63 = vld [vmem:[#allocation2 + $0x14] sm:$0xff]   ;;  %s6647_s12 = smov (!%p5752_p10, %s6645_s12), 15 }
  0x3b   : > { %v4436_v47 = vcombine.low %v695_v39, %v696_v31  ;;  %v1484_v49 = vshrl.u32 %v5288_v19, 16  ;;  %v1488_v51 = vrot.slane %v1486_v35, 1  ;;  %v1491_v52 = vshll.u32 %v5686_v34, 16  ;;  %v5701_v0 = vld [vmem:[%s6623_s3 + $0xa] sm:$0x3]  ;;  %s5794_s24 = sshll.u32 %s6647_s12, 1 }
  0x3c   : > { %4901 = vmatmul.mubr.msk.bf16.gmra.mxu0 %vm798_vm4, %v4433_v16  ;;  %v4468_v56 = vcombine.low %v694_v38, %v695_v39  ;;  %v1041_v59 = vsel %vm1015_vm5, %v1031_v24, %v1040_v40  ;;  %v1054_v60 = vrot.slane %v1052_v3, 3  ;;  %v1057_v61 = vrot.slane %v1055_v41, 4  ;;  %v5291_v16 = vld [vmem:[#allocation2 + $0x1c] sm:$0xff]   ;;  %v5292_v39 = vld [vmem:[#allocation2 + $0x24] sm:$0xff]   ;;  %s348_s14 = sadd.s32 %s5794_s24, %s5512_s30 }
  0x3d   : > { %4904 = vmatprep.mubr.msk.bf16.mxu0 %vm798_vm4, %v4434_v22  ;;  %v4469_v62 = vcombine.low %v696_v31, %v697_v46  ;;  %v1050_v5 = vsel %vm1015_vm5, %v1040_v40, %v1049_v43  ;;  %v1063_v8 = vrot.slane %v1061_v44, 3  ;;  %v1066_v9 = vrot.slane %v1064_v45, 4  ;;  %s4364_s30 = sshll.u32 %s348_s14, 2 }
  0x3e   : > { %v1489_v10 = vor.u32 %v1488_v51, %v1484_v49  ;;  %v1493_v11 = vrot.slane %v1491_v52, 1  ;;  %v4437_v17 = vcombine.low %v697_v46, %v698_v55  ;;  %v1058_v18 = vor.u32 %v1057_v61, %v1054_v60  ;;  %s5841_s23 = scalar_lea.vmem %s6622_s2, %s4364_s30 }
  0x3f   : > { %4925 = vmatmul.mubr.msk.bf16.gmra.mxu1 %vm798_vm4, %v4445_v28  ;;  %v1070_v19 = vshrl.u32 %v4468_v56, 16  ;;  %v1073_v20 = vshll.u32 %v4468_v56, 16  ;;  %v1079_v21 = vshrl.u32 %v4469_v62, 16  ;;  %v1082_v22 = vshll.u32 %v4469_v62, 16 }
  0x40   : > { %4930 = vmatprep.mubr.msk.bf16.mxu1 %vm798_vm4, %v1032_v33  ;;  %v1499_v24 = vshll.u32 %v5290_v63, 16  ;;  %v1067_v26 = vor.u32 %v1066_v9, %v1063_v8  ;;  %v1495_v27 = vshrl.u32 %v5686_v34, 16  ;;  %v4470_v28 = vcombine.low %v698_v55, %v5577_v53  ;;  %v5728_v8 = vld [vmem:[%s6623_s3 + $0xc] sm:$0x3] }
  0x41   : > { %v1494_v29 = vsel %vm1482_vm6, %v1489_v10, %v1493_v11  ;;  %v1503_v30 = vshrl.u32 %v5290_v63, 16  ;;  %v1507_v31 = vshll.u32 %v5291_v16, 16  ;;  %v4471_v32 = vcombine.low %v5579_v54, %v5583_v57  ;;  %v5293_v54 = vld [vmem:[#allocation2 + $0x2c] sm:$0xff]  }
  0x42   : > { %v1059_v33 = vsel %vm1015_vm5, %v1049_v43, %v1058_v18  ;;  %v1072_v35 = vrot.slane %v1070_v19, 3  ;;  %v1075_v37 = vrot.slane %v1073_v20, 4  ;;  %v1501_v38 = vrot.slane %v1499_v24, 1 }
  0x43   : > { %v1068_v40 = vsel %vm1015_vm5, %v1058_v18, %v1067_v26  ;;  %v1081_v34 = vrot.slane %v1079_v21, 3  ;;  %v1084_v3 = vrot.slane %v1082_v22, 4  ;;  %v1497_v53 = vor.u32 %v1495_v27, %v1493_v11  ;;  %v5295_v18 = vld [vmem:[#allocation2 + $0x3c] sm:$0xff]  }
  0x44   : > { %4905 = vmatmul.mubr.msk.bf16.gmra.mxu0 %vm798_vm4, %v4435_v42  ;;  %v1505_v41 = vor.u32 %v1503_v30, %v1501_v38  ;;  %v1509_v42 = vrot.slane %v1507_v31, 1  ;;  %v1088_v57 = vshrl.u32 %v4470_v28, 16  ;;  %v1091_v43 = vshll.u32 %v4470_v28, 16 }
  0x45   : > { %4908 = vmatprep.mubr.msk.bf16.mxu0 %vm798_vm4, %v4436_v47  ;;  %v1097_v44 = vshrl.u32 %v4471_v32, 16  ;;  %v1076_v45 = vor.u32 %v1075_v37, %v1072_v35  ;;  %v1100_v46 = vshll.u32 %v4471_v32, 16  ;;  %v1515_v47 = vshll.u32 %v5292_v39, 16  ;;  %v5296_v35 = vld [vmem:[#allocation2 + $0x44] sm:$0xff]  }
  0x46   : > { %v1502_v49 = vsel %vm1482_vm6, %v1497_v53, %v1501_v38  ;;  %v2376_v51 = vsel %vm847_vm0, %v5661_v50, 0  ;;  %v1511_v52 = vshrl.u32 %v5291_v16, 16  ;;  %v4472_v55 = vcombine.low %v5585_v58, %v5603_v1  ;;  %v5294_v1 = vld [vmem:[#allocation2 + $0x34] sm:$0xff]  }
  0x47   : > { %4931 = vmatmul.mubr.msk.bf16.vlgmr.msra.gmra.mxu1 %vm798_vm4, %v1041_v59  ;;  %v1510_v56 = vsel %vm1482_vm6, %v1505_v41, %v1509_v42  ;;  %v1519_v59 = vshrl.u32 %v5292_v39, 16  ;;  %v1523_v60 = vshll.u32 %v5293_v54, 16  ;;  %v1090_v61 = vrot.slane %v1088_v57, 3 }
  0x48   : > { %4997 = vmatpush3.bf16.msra.mxu1 %v2146_v48  ;;  %4934 = vmatprep.mubr.msk.bf16.mxu1 %vm798_vm4, %v1050_v5  ;;  %v1085_v48 = vor.u32 %v1084_v3, %v1081_v34  ;;  %v1093_v62 = vrot.slane %v1091_v43, 4  ;;  %v1099_v63 = vrot.slane %v1097_v44, 3  ;;  %v1077_v5 = vsel %vm1015_vm5, %v1067_v26, %v1076_v45 }
  0x49   : > { %5208 = vmatprep.subr.msk.bf16.mxu1 %vm847_vm0, %v5701_v0  ;;  %v1102_v9 = vrot.slane %v1100_v46, 4  ;;  %v4473_v50 = vcombine.low %v5606_v4, %v5609_v6  ;;  %v1517_v58 = vrot.slane %v1515_v47, 1  ;;  %v1513_v11 = vor.u32 %v1511_v52, %v1509_v42  ;;  %v5298_v47 = vld [vmem:[#allocation2 + $0x54] sm:$0xff]  }
  0x4a   : > { %v1086_v10 = vsel %vm1015_vm5, %v1076_v45, %v1085_v48  ;;  %v1106_v19 = vshrl.u32 %v4472_v55, 16  ;;  %v1109_v4 = vshll.u32 %v4472_v55, 16  ;;  %v1094_v6 = vor.u32 %v1093_v62, %v1090_v61 }
  0x4b   : > { %v1521_v16 = vor.u32 %v1519_v59, %v1517_v58  ;;  %v1531_v20 = vshll.u32 %v5294_v1, 16  ;;  %v1103_v21 = vor.u32 %v1102_v9, %v1099_v63  ;;  %v1115_v22 = vshrl.u32 %v4473_v50, 16  ;;  %v5772_v9 = vld [vmem:[#allocation2 + $0x14] sm:$0xf] }
  0x4c   : > { %4909 = vmatmul.mubr.msk.bf16.gmra.mxu0 %vm798_vm4, %v4437_v17  ;;  %v1525_v17 = vrot.slane %v1523_v60, 1  ;;  %v1118_v24 = vshll.u32 %v4473_v50, 16  ;;  %v1518_v26 = vsel %vm1482_vm6, %v1513_v11, %v1517_v58  ;;  %v1527_v27 = vshrl.u32 %v5293_v54, 16  ;;  %v5776_v11 = vld [vmem:[#allocation2 + $0x64] sm:$0xff]  }
  0x4d   : > { %4964 = vmatprep.mubr.msk.bf16.mxu0 %vm798_vm4, %v1494_v29  ;;  %v4474_v28 = vcombine.low %v5611_v7, %v5619_v13  ;;  %v1535_v30 = vshrl.u32 %v5294_v1, 16  ;;  %v1539_v31 = vshll.u32 %v5295_v18, 16  ;;  %v4475_v32 = vcombine.low %v5621_v14, %v5636_v25  ;;  %v5297_v25 = vld [vmem:[#allocation2 + $0x4c] sm:$0xff]  }
  0x4e   : > { %v1526_v29 = vsel %vm1482_vm6, %v1521_v16, %v1525_v17  ;;  %v1108_v37 = vrot.slane %v1106_v19, 3  ;;  %v1111_v38 = vrot.slane %v1109_v4, 4  ;;  %v1533_v39 = vrot.slane %v1531_v20, 1  ;;  %v5783_v20 = vld [vmem:[#allocation2 + $0x1c] sm:$0xf] }
  0x4f   : > { %4935 = vmatmul.mubr.msk.bf16.gmra.mxu1 %vm798_vm4, %v1059_v33  ;;  %v1095_v33 = vsel %vm1015_vm5, %v1085_v48, %v1094_v6  ;;  %v1117_v34 = vrot.slane %v1115_v22, 3  ;;  %v1120_v3 = vrot.slane %v1118_v24, 4  ;;  %v1529_v7 = vor.u32 %v1527_v27, %v1525_v17 }
  0x50   : > { %4938 = vmatprep.mubr.msk.bf16.mxu1 %vm798_vm4, %v1068_v40  ;;  %v1104_v40 = vsel %vm1015_vm5, %v1094_v6, %v1103_v21  ;;  %v1537_v13 = vor.u32 %v1535_v30, %v1533_v39  ;;  %v1541_v14 = vrot.slane %v1539_v31, 1  ;;  %v1547_v53 = vshll.u32 %v5296_v35, 16  ;;  %v5781_v6 = vld [vmem:[#allocation2 + $0x18] sm:$0xf] }
  0x51   : > { %v1112_v41 = vor.u32 %v1111_v38, %v1108_v37  ;;  %v1124_v42 = vshrl.u32 %v4474_v28, 16  ;;  %v1127_v54 = vshll.u32 %v4474_v28, 16  ;;  %v1121_v57 = vor.u32 %v1120_v3, %v1117_v34  ;;  %v5799_v38 = vld [vmem:[#allocation2 + $0x6c] sm:$0xff]  }
  0x52   : > { %v1133_v43 = vshrl.u32 %v4475_v32, 16  ;;  %v1136_v44 = vshll.u32 %v4475_v32, 16  ;;  %v1534_v45 = vsel %vm1482_vm6, %v1529_v7, %v1533_v39  ;;  %v1543_v46 = vshrl.u32 %v5295_v18, 16 }
  0x53   : > { %v4476_v48 = vcombine.low %v5646_v36, %v5667_v2  ;;  %v1555_v52 = vshll.u32 %v5297_v25, 16  ;;  %v4477_v55 = vcombine.low %v5672_v12, %v5674_v15  ;;  %v1126_v59 = vrot.slane %v1124_v42, 3  ;;  %v5770_v15 = vld [vmem:[#allocation2 + $0x5c] sm:$0xff]  }
  0x54   : > { %4965 = vmatmul.mubr.msk.bf16.vlgmr.msra.gmra.mxu0 %vm798_vm4, %v1502_v49  ;;  %v1542_v49 = vsel %vm1482_vm6, %v1537_v13, %v1541_v14  ;;  %v1129_v60 = vrot.slane %v1127_v54, 4  ;;  %v1549_v61 = vrot.slane %v1547_v53, 1  ;;  %v1122_v62 = vsel %vm1015_vm5, %v1112_v41, %v1121_v57  ;;  %v5809_v54 = vld [vmem:[#allocation2 + $0x24] sm:$0xf] }
  0x55   : > { %5031 = vmatpush3.bf16.msra.mxu0 %v2376_v51  ;;  %4968 = vmatprep.mubr.msk.bf16.mxu0 %vm798_vm4, %v1510_v56  ;;  %v1551_v51 = vshrl.u32 %v5296_v35, 16  ;;  %v1113_v56 = vsel %vm1015_vm5, %v1103_v21, %v1112_v41  ;;  %v1135_v36 = vrot.slane %v1133_v43, 3  ;;  %v1138_v2 = vrot.slane %v1136_v44, 4 }
  0x56   : > { %5209 = vmatprep.subr.msk.bf16.mxu0 %vm847_vm0, %v5728_v8  ;;  %v1545_v63 = vor.u32 %v1543_v46, %v1541_v14  ;;  %v1563_v12 = vshll.u32 %v5298_v47, 16  ;;  %v1557_v58 = vrot.slane %v1555_v52, 1  ;;  %v1559_v1 = vshrl.u32 %v5297_v25, 16  ;;  %v5804_v25 = vld [vmem:[#allocation2 + $0x20] sm:$0xf]  ;;  %v5812_v46 = vld [vmem:[#allocation2 + $0x74] sm:$0xff]  }
  0x57   : > { %4939 = vmatmul.mubr.msk.bf16.gmra.mxu1 %vm798_vm4, %v1077_v5  ;;  %v1827_v5 = vld [vmem:[#allocation2 + $0x10] sm:$0x8]  ;;  %v1553_v50 = vor.u32 %v1551_v51, %v1549_v61  ;;  %v1142_v16 = vshrl.u32 %v4476_v48, 16  ;;  %v1145_v17 = vshll.u32 %v4476_v48, 16  ;;  %v1139_v18 = vor.u32 %v1138_v2, %v1135_v36  ;;  %v5814_v48 = vld [vmem:[#allocation2 + $0x28] sm:$0xf] }
  0x58   : > { %4942 = vmatprep.mubr.msk.bf16.mxu1 %vm798_vm4, %v1086_v10  ;;  %v1130_v10 = vor.u32 %v1129_v60, %v1126_v59  ;;  %v1151_v19 = vshrl.u32 %v4477_v55, 16  ;;  %v1154_v4 = vshll.u32 %v4477_v55, 16  ;;  %v4478_v21 = vcombine.low %v5679_v23, %v5679_v23 }
  0x59   : > { %v1550_v22 = vsel %vm1482_vm6, %v1545_v63, %v1549_v61  ;;  %v1565_v24 = vrot.slane %v1563_v12, 1  ;;  %v1558_v27 = vsel %vm1482_vm6, %v1553_v50, %v1557_v58  ;;  %v1561_v28 = vor.u32 %v1559_v1, %v1557_v58  ;;  %v5334_v58 = vld [vmem:[%s5522_s11 + $0x3c] ss:$0 sps:$4 sm:$0xff]   ;;  %s649_s11 = scalar_select %p646_p11, 1, 0 }
  0x5a   : > { %v4530_v30 = vcombine.low %v1827_v5, %v5772_v9  ;;  %v1131_v31 = vsel %vm1015_vm5, %v1121_v57, %v1130_v10  ;;  %v1144_v32 = vrot.slane %v1142_v16, 3  ;;  %v4531_v35 = vcombine.low %v5781_v6, %v5783_v20  ;;  %v5834_v16 = vld [vmem:[#allocation2 + $0x30] sm:$0xf] }
  0x5b   : > { %v1579_v23 = vshll.u32 %v5776_v11, 16  ;;  %v1140_v37 = vsel %vm1015_vm5, %v1130_v10, %v1139_v18  ;;  %v1153_v39 = vrot.slane %v1151_v19, 3  ;;  %v1575_v3 = vshrl.u32 %v5770_v15, 16 }
  0x5c   : > { %4969 = vmatmul.mubr.msk.bf16.gmra.mxu0 %vm798_vm4, %v1518_v26  ;;  %v1571_v26 = vshll.u32 %v5770_v15, 16  ;;  %v1160_v7 = vshrl.u32 %v4478_v21, 16  ;;  %v1163_v13 = vshll.u32 %v4478_v21, 16  ;;  %v1946_v53 = vshrl.u32 %v4530_v30, 16 }
  0x5d   : > { %4972 = vmatprep.mubr.msk.bf16.mxu0 %vm798_vm4, %v1526_v29  ;;  %v1567_v29 = vshrl.u32 %v5298_v47, 16  ;;  %v1949_v41 = vshll.u32 %v4530_v30, 16  ;;  %v1954_v57 = vshrl.u32 %v4531_v35, 16  ;;  %v1957_v43 = vshll.u32 %v4531_v35, 16 }
  0x5e   : > { %v1573_v34 = vrot.slane %v1571_v26, 1  ;;  %v1566_v44 = vsel %vm1482_vm6, %v1561_v28, %v1565_v24  ;;  %v1583_v51 = vshrl.u32 %v5776_v11, 16  ;;  %v1587_v52 = vshll.u32 %v5799_v38, 16  ;;  %v5832_v11 = vld [vmem:[#allocation2 + $0x7c] sm:$0xff]  }
  0x5f   : > { %4943 = vmatmul.mubr.msk.bf16.gmra.mxu1 %vm798_vm4, %v1095_v33  ;;  %v1147_v33 = vrot.slane %v1145_v17, 4  ;;  %v1569_v14 = vor.u32 %v1567_v29, %v1565_v24  ;;  %v1162_v55 = vrot.slane %v1160_v7, 3  ;;  %v1948_v61 = vrot.slane %v1946_v53, 3  ;;  %v5836_v17 = vld [vmem:[#allocation2 + $0x34] sm:$0xf] }
  0x60   : > { %4946 = vmatprep.mubr.msk.bf16.mxu1 %vm798_vm4, %v1104_v40  ;;  %v1156_v40 = vrot.slane %v1154_v4, 4  ;;  %v1577_v60 = vor.u32 %v1575_v3, %v1573_v34  ;;  %v4532_v2 = vcombine.low %v5804_v25, %v5809_v54  ;;  %v1956_v63 = vrot.slane %v1954_v57, 3 }
  0x61   : > { %v1148_v42 = vor.u32 %v1147_v33, %v1144_v32  ;;  %v1574_v59 = vsel %vm1482_vm6, %v1569_v14, %v1573_v34  ;;  %v1959_v12 = vrot.slane %v1957_v43, 4  ;;  %v1595_v15 = vshll.u32 %v5812_v46, 16 }
  0x62   : > { %v1157_v47 = vor.u32 %v1156_v40, %v1153_v39  ;;  %v1589_v10 = vrot.slane %v1587_v52, 1  ;;  %v1591_v19 = vshrl.u32 %v5799_v38, 16  ;;  %v1963_v24 = vshrl.u32 %v4532_v2, 16  ;;  %v647_v38 = vld [vmem:[%s5841_s23] sm:$0xf] }
  0x63   : > { %v1149_v36 = vsel %vm1015_vm5, %v1139_v18, %v1148_v42  ;;  %v1966_v26 = vshll.u32 %v4532_v2, 16  ;;  %v1597_v28 = vrot.slane %v1595_v15, 1  ;;  %v1599_v33 = vshrl.u32 %v5812_v46, 16 }
  0x64   : > { %4973 = vmatmul.mubr.msk.bf16.gmra.mxu0 %vm798_vm4, %v1534_v45  ;;  %v1581_v45 = vrot.slane %v1579_v23, 1  ;;  %v1158_v5 = vsel %vm1015_vm5, %v1148_v42, %v1157_v47  ;;  %v1603_v35 = vshll.u32 %v5832_v11, 16  ;;  %v5855_v23 = vld [vmem:[#allocation2 + $0x3c] sm:$0xf]  ;;  %v4534_v40 = vcombine.low %v5834_v16, %v5836_v17 }
  0x65   : > { %4976 = vmatprep.mubr.msk.bf16.mxu0 %vm798_vm4, %v1542_v49  ;;  %v5816_v49 = vld [vmem:[#allocation2 + $0x2c] sm:$0xf]  ;;  %v650_v3 = vstv %s649_s11  ;;  %v1968_v14 = vrot.slane %v1966_v26, 4 }
  0x66   : > { %v4533_v50 = vcombine.low %v5814_v48, %v5816_v49  ;;  %v1585_v1 = vor.u32 %v1583_v51, %v1581_v45  ;;  %v1582_v18 = vsel %vm1482_vm6, %v1577_v60, %v1581_v45  ;;  %vm5863_vm7 = vcmp.eq.s32.totalorder %v650_v3, 1  ;;  %v5304_v45 = vld [vmem:[#allocation2 + $0x84] ss:$0 sps:$4 sm:$0x11]  }
  0x67   : > { %4947 = vmatmul.mubr.msk.bf16.gmra.mxu1 %vm798_vm4, %v1113_v56  ;;  %v1165_v56 = vrot.slane %v1163_v13, 4  ;;  %v1965_v13 = vrot.slane %v1963_v24, 3  ;;  %v652_v43 = vsel %vm5863_vm7, %v647_v38, 0  ;;  %v1605_v51 = vrot.slane %v1603_v35, 1 }
  0x68   : > { %4950 = vmatprep.mubr.msk.bf16.mxu1 %vm798_vm4, %v1122_v62  ;;  %v1951_v62 = vrot.slane %v1949_v41, 4  ;;  %v1972_v29 = vshrl.u32 %v4533_v50, 16  ;;  %v1975_v30 = vshll.u32 %v4533_v50, 16  ;;  %v1590_v32 = vsel %vm1482_vm6, %v1585_v1, %v1589_v10 }
  0x69   : > { %v1166_v4 = vor.u32 %v1165_v56, %v1162_v55  ;;  %v4423_v46 = vcombine.low %v652_v43, %v652_v43  ;;  %v1981_v52 = vshrl.u32 %v4534_v40, 16  ;;  %v5875_v55 = vld [vmem:[#allocation2 + $0x40] sm:$0xf]  ;;  %v5877_v56 = vld [vmem:[#allocation2 + $0x44] sm:$0xf]  ;;  %v1984_v60 = vshll.u32 %v4534_v40, 16 }
  0x6a   : > { %v1952_v21 = vor.u32 %v1951_v62, %v1948_v61  ;;  %v1974_v41 = vrot.slane %v1972_v29, 3  ;;  %v1977_v42 = vrot.slane %v1975_v30, 4  ;;  %v5880_v61 = vld [vmem:[#allocation2 + $0x48] sm:$0xf]  ;;  %v1607_v50 = vshrl.u32 %v5832_v11, 16 }
  0x6b   : > { %v1167_v39 = vsel %vm1015_vm5, %v1157_v47, %v1166_v4  ;;  %v1601_v47 = vor.u32 %v1599_v33, %v1597_v28  ;;  %v5883_v62 = vsel %vm381_vm1, 0, %v4423_v46  ;;  %v1986_v4 = vrot.slane %v1984_v60, 4  ;;  %v5909_v30 = vld [vmem:[#allocation2 + $0x50] sm:$0xf]  ;;  %v5932_v46 = vld [vmem:[#allocation2 + $0x60] sm:$0xf] }
  0x6c   : > { %4977 = vmatmul.mubr.msk.bf16.gmra.mxu0 %vm798_vm4, %v1550_v22  ;;  %v1960_v22 = vor.u32 %v1959_v12, %v1956_v63  ;;  %v5885_v12 = vld [vmem:[#allocation2 + $0x4c] sm:$0xf]  ;;  %v4425_v15 = vcombine.low %v5883_v62, %v5883_v62  ;;  %v5937_v60 = vld [vmem:[#allocation2 + $0x68] sm:$0xf] }
  0x6d   : > { %4980 = vmatprep.mubr.msk.bf16.mxu0 %vm798_vm4, %v1558_v27  ;;  %v5849_v27 = vld [vmem:[#allocation2 + $0x38] sm:$0xf]  ;;  %v1606_v1 = vsel %vm1482_vm6, %v1601_v47, %v1605_v51  ;;  %v5934_v47 = vld [vmem:[#allocation2 + $0x64] sm:$0xf] }
  0x6e   : > { %v1961_v7 = vsel %vm1015_vm5, %v1952_v21, %v1960_v22  ;;  %v4535_v57 = vcombine.low %v5849_v27, %v5855_v23  ;;  %678 = vst.msk [vmem:[#allocation2 + $0x90] sm:$0xf] %vm401_vm2, %v4425_v15  ;;  %v4536_v21 = vcombine.low %v5875_v55, %v5877_v56  ;;  %v5943_v15 = vld [vmem:[#allocation2 + $0x6c] sm:$0xf] }
  0x6f   : > { %4951 = vmatmul.mubr.msk.bf16.gmra.mxu1 %vm798_vm4, %v1131_v31  ;;  %v501_v31 = vsel %vm381_vm1, %v5334_v58, 0  ;;  %v1611_v58 = vshll.u32 %v5304_v45, 16 }
  0x70   : > { %4954 = vmatprep.mubr.msk.bf16.mxu1 %vm798_vm4, %v1140_v37  ;;  %v4421_v37 = vcombine.low %v501_v31, %v501_v31  ;;  %v4422_v34 = vcombine.high %v501_v31, %v501_v31  ;;  %v1990_v2 = vshrl.u32 %v4535_v57, 16  ;;  %v1993_v63 = vshll.u32 %v4535_v57, 16  ;;  %v5911_v31 = vld [vmem:[#allocation2 + $0x54] sm:$0xf] }
  0x71   : > { %v1613_v29 = vrot.slane %v1611_v58, 1  ;;  %v1999_v33 = vshrl.u32 %v4536_v21, 16  ;;  %v2002_v35 = vshll.u32 %v4536_v21, 16  ;;  %v4567_v21 = vcombine.low %v5816_v49, %v5834_v16 }
  0x72   : > { %644 = vst.msk [vmem:[#allocation2 + $0x88] sm:$0xf] %vm401_vm2, %v4421_v37  ;;  %645 = vst.msk [vmem:[#allocation2 + $0x8c] sm:$0xf] %vm401_vm2, %v4422_v34  ;;  %v1992_v11 = vrot.slane %v1990_v2, 3  ;;  %v1995_v26 = vrot.slane %v1993_v63, 4  ;;  %v4566_v63 = vcombine.low %v5809_v54, %v5814_v48 }
  0x73   : > { %v5914_v37 = vld [vmem:[#allocation2 + $0x58] sm:$0xf]  ;;  %v5916_v34 = vld [vmem:[#allocation2 + $0x5c] sm:$0xf] }
  0x74   : > { %4981 = vmatmul.mubr.msk.bf16.gmra.mxu0 %vm798_vm4, %v1566_v44  ;;  %v1593_v44 = vor.u32 %v1591_v19, %v1589_v10  ;;  %v2838_v10 = vsel %vm847_vm0, %v5701_v0, 0  ;;  %v1983_v19 = vrot.slane %v1981_v52, 3  ;;  %v1609_v0 = vor.u32 %v1607_v50, %v1605_v51 }
  0x75   : > { %4984 = vmatprep.mubr.msk.bf16.mxu0 %vm798_vm4, %v1574_v59  ;;  %v1969_v59 = vor.u32 %v1968_v14, %v1965_v13  ;;  %v1996_v38 = vor.u32 %v1995_v26, %v1992_v11  ;;  %v4538_v13 = vcombine.low %v5909_v30, %v5911_v31  ;;  %v4539_v57 = vcombine.low %v5914_v37, %v5916_v34 }
  0x76   : > { %v1614_v3 = vsel %vm1482_vm6, %v1609_v0, %v1613_v29  ;;  %v5968_v0 = vld [vmem:[#allocation2 + $0x74] sm:$0xf]  ;;  %v4568_v29 = vcombine.low %v5836_v17, %v5849_v27 }
  0x77   : > { %4955 = vmatmul.mubr.msk.bf16.gmra.mxu1 %vm798_vm4, %v1149_v36  ;;  %v1978_v36 = vor.u32 %v1977_v42, %v1974_v41  ;;  %v2001_v41 = vrot.slane %v1999_v33, 3  ;;  %v2004_v42 = vrot.slane %v2002_v35, 4  ;;  %v2026_v52 = vshrl.u32 %v4539_v57, 16  ;;  %v5974_v33 = vld [vmem:[#allocation2 + $0x7c] sm:$0xf] }
  0x78   : > { %4958 = vmatprep.mubr.msk.bf16.mxu1 %vm798_vm4, %v1158_v5  ;;  %v1598_v5 = vsel %vm1482_vm6, %v1593_v44, %v1597_v28  ;;  %v4537_v28 = vcombine.low %v5880_v61, %v5885_v12 }
  0x79   : > { %v1979_v24 = vsel %vm1015_vm5, %v1969_v59, %v1978_v36  ;;  %v2005_v51 = vor.u32 %v2004_v42, %v2001_v41  ;;  %v2028_v54 = vrot.slane %v2026_v52, 3 }
  0x7a   : > { %v2011_v40 = vshll.u32 %v4537_v28, 16 }
  0x7b   : > { %v2006_v50 = vsel %vm1015_vm5, %v1996_v38, %v2005_v51 }
  0x7c   : > { %4985 = vmatmul.mubr.msk.bf16.gmra.mxu0 %vm798_vm4, %v1582_v18  ;;  %v1970_v18 = vsel %vm1015_vm5, %v1960_v22, %v1969_v59  ;;  %v5906_v22 = vld [vmem:[%s6623_s3 + $0xe] sm:$0x3]  ;;  %v2013_v45 = vrot.slane %v2011_v40, 4  ;;  %v2029_v59 = vshll.u32 %v4539_v57, 16 }
  0x7d   : > { %4988 = vmatprep.mubr.msk.bf16.mxu0 %vm798_vm4, %v1590_v32  ;;  %v1987_v32 = vor.u32 %v1986_v4, %v1983_v19 }
  0x7e   : > { %v2031_v48 = vrot.slane %v2029_v59, 4 }
  0x7f   : > { %4959 = vmatmul.mubr.msk.bf16.gmra.mxu1 %vm798_vm4, %v1167_v39  ;;  %v2008_v39 = vshrl.u32 %v4537_v28, 16  ;;  %v1988_v14 = vsel %vm1015_vm5, %v1978_v36, %v1987_v32  ;;  %v1997_v43 = vsel %vm1015_vm5, %v1987_v32, %v1996_v38  ;;  %v4565_v36 = vcombine.low %v5783_v20, %v5804_v25  ;;  %v5953_v20 = vld [vmem:[%s6623_s3 + $0x10] sm:$0x3]  ;;  %v5972_v32 = vld [vmem:[#allocation2 + $0x78] sm:$0xf] }
  0x80   : > { %4998 = vmatprep.mubr.msk.bf16.mxu1 %vm798_vm4, %v1961_v7  ;;  %v4564_v7 = vcombine.low %v5772_v9, %v5781_v6  ;;  %v2017_v9 = vshrl.u32 %v4538_v13, 16  ;;  %v2020_v6 = vshll.u32 %v4538_v13, 16  ;;  %v5966_v28 = vld [vmem:[#allocation2 + $0x70] sm:$0xf]  ;;  %v4543_v17 = vcombine.low %v5972_v32, %v5974_v33 }
  0x81   : > { %v2010_v44 = vrot.slane %v2008_v39, 3  ;;  %v4542_v49 = vcombine.low %v5966_v28, %v5968_v0 }
  0x82   : > { %v2019_v58 = vrot.slane %v2017_v9, 3  ;;  %v2062_v42 = vshrl.u32 %v4543_v17, 16  ;;  %v2065_v57 = vshll.u32 %v4543_v17, 16  ;;  %v5994_v9 = vld [vmem:[#allocation2 + $0x88] sm:$0xf] }
  0x83   : > { %v2014_v2 = vor.u32 %v2013_v45, %v2010_v44  ;;  %v2056_v13 = vshll.u32 %v4542_v49, 16  ;;  %v5990_v44 = vld [vmem:[#allocation2 + $0x84] sm:$0xf]  ;;  %v4570_v45 = vcombine.low %v5877_v56, %v5880_v61  ;;  %v4571_v61 = vcombine.low %v5885_v12, %v5909_v30 }
  0x84   : > { %4989 = vmatmul.mubr.msk.bf16.gmra.mxu0 %vm798_vm4, %v1598_v5  ;;  %v3320_v5 = vsel %vm847_vm0, %v5728_v8, 0  ;;  %v4541_v8 = vcombine.low %v5937_v60, %v5943_v15 }
  0x85   : > { %4992 = vmatprep.mubr.msk.bf16.mxu0 %vm798_vm4, %v1606_v1  ;;  %v2022_v1 = vrot.slane %v2020_v6, 4  ;;  %v2015_v25 = vsel %vm1015_vm5, %v2005_v51, %v2014_v2  ;;  %v5996_v6 = vld [vmem:[#allocation2 + $0x8c] sm:$0xf]  ;;  %v2058_v59 = vrot.slane %v2056_v13, 4 }
  0x86   : > { %v2044_v11 = vshrl.u32 %v4541_v8, 16  ;;  %v2047_v26 = vshll.u32 %v4541_v8, 16  ;;  %v4545_v56 = vcombine.low %v5994_v9, %v5996_v6  ;;  %v648_v8 = vld [vmem:[%s5841_s23 + $0x4] sm:$0xf] }
  0x87   : > { %4999 = vmatmul.mubr.msk.bf16.vlgmr.msra.gmra.mxu1 %vm798_vm4, %v1970_v18  ;;  %v2023_v18 = vor.u32 %v2022_v1, %v2019_v58 }
  0x88   : > { %5065 = vmatpush3.bf16.msra.mxu1 %v2838_v10  ;;  %5002 = vmatprep.mubr.msk.bf16.mxu1 %vm798_vm4, %v1979_v24  ;;  %v4540_v10 = vcombine.low %v5932_v46, %v5934_v47  ;;  %v2032_v24 = vor.u32 %v2031_v48, %v2028_v54  ;;  %v2046_v40 = vrot.slane %v2044_v11, 3  ;;  %v2080_v1 = vshrl.u32 %v4545_v56, 16 }
  0x89   : > { %5210 = vmatprep.subr.msk.bf16.mxu1 %vm847_vm0, %v5906_v22  ;;  %v2024_v35 = vsel %vm1015_vm5, %v2014_v2, %v2023_v18  ;;  %v2067_v2 = vrot.slane %v2065_v57, 4  ;;  %v4426_v54 = vcombine.high %v5883_v62, %v5883_v62  ;;  %v4572_v48 = vcombine.low %v5911_v31, %v5914_v37  ;;  %v5337_v62 = vld [vmem:[#allocation2 + $0x14] sm:$0xff]   ;;  %v6044_v57 = vld [vmem:[#allocation2 + $0x2c] sm:$0xf] }
  0x8a   : > { %v2035_v19 = vshrl.u32 %v4540_v10, 16  ;;  %v2038_v4 = vshll.u32 %v4540_v10, 16  ;;  %v2033_v16 = vsel %vm1015_vm5, %v2023_v18, %v2032_v24  ;;  %v2083_v10 = vshll.u32 %v4545_v56, 16 }
  0x8b   : > { %679 = vst.msk [vmem:[#allocation2 + $0x94] sm:$0xf] %vm401_vm2, %v4426_v54  ;;  %v653_v31 = vsel %vm5863_vm7, %v648_v8, 0  ;;  %v4573_v11 = vcombine.low %v5916_v34, %v5932_v46 }
  0x8c   : > { %4993 = vmatmul.mubr.msk.bf16.gmra.mxu0 %vm798_vm4, %v1614_v3  ;;  %v2037_v38 = vrot.slane %v2035_v19, 3  ;;  %v2040_v39 = vrot.slane %v2038_v4, 4  ;;  %v2049_v3 = vrot.slane %v2047_v26, 4  ;;  %v4424_v37 = vcombine.low %v653_v31, %v653_v31 }
  0x8d   : > { %5032 = vmatprep.mubr.msk.bf16.mxu0 %vm798_vm4, %v4564_v7  ;;  %v2053_v7 = vshrl.u32 %v4542_v49, 16  ;;  %v5338_v49 = vld [vmem:[#allocation2 + $0x1c] sm:$0xff]   ;;  %v4578_v31 = vcombine.low %v5990_v44, %v5994_v9 }
  0x8e   : > { %v2041_v27 = vor.u32 %v2040_v39, %v2037_v38  ;;  %v2050_v41 = vor.u32 %v2049_v3, %v2046_v40  ;;  %v663_v38 = vsel %vm381_vm1, %v4424_v37, 0  ;;  %v4574_v3 = vcombine.low %v5934_v47, %v5937_v60  ;;  %v5339_v47 = vld [vmem:[#allocation2 + $0x24] sm:$0xff]  }
  0x8f   : > { %5003 = vmatmul.mubr.msk.bf16.gmra.mxu1 %vm798_vm4, %v1988_v14  ;;  %v4569_v14 = vcombine.low %v5855_v23, %v5875_v55  ;;  %v2055_v52 = vrot.slane %v2053_v7, 3  ;;  %v4427_v53 = vcombine.low %v663_v38, %v663_v38  ;;  %v4428_v40 = vcombine.high %v663_v38, %v663_v38  ;;  %v6042_v60 = vld [vmem:[#allocation2 + $0x28] sm:$0xf]  ;;  %v6079_v38 = vld [vmem:[#allocation2 + $0x40] sm:$0xf] }
  0x90   : > { %5006 = vmatprep.mubr.msk.bf16.mxu1 %vm798_vm4, %v1997_v43  ;;  %v5988_v43 = vld [vmem:[#allocation2 + $0x80] sm:$0xf]  ;;  %v2042_v51 = vsel %vm1015_vm5, %v2032_v24, %v2041_v27  ;;  %v2051_v55 = vsel %vm1015_vm5, %v2041_v27, %v2050_v41  ;;  %v2085_v24 = vrot.slane %v2083_v10, 4  ;;  %v2658_v7 = vshrl.u32 %v5337_v62, 16 }
  0x91   : > { %v4544_v23 = vcombine.low %v5988_v43, %v5990_v44  ;;  %680 = vst.msk [vmem:[#allocation2 + $0x98] sm:$0xf] %vm401_vm2, %v4427_v53  ;;  %681 = vst.msk [vmem:[#allocation2 + $0x9c] sm:$0xf] %vm401_vm2, %v4428_v40  ;;  %v2673_v56 = vshll.u32 %v5339_v47, 16  ;;  %v4577_v8 = vcombine.low %v5974_v33, %v5988_v43 }
  0x92   : > { %v6085_v44 = vld [vmem:[#allocation2 + $0x44] sm:$0xf] }
  0x93   : > { %v2675_v54 = vrot.slane %v2673_v56, 1 }
  0x94   : > { %5033 = vmatmul.mubr.msk.bf16.vlgmr.msra.gmra.mxu0 %vm798_vm4, %v4565_v36  ;;  %v2064_v36 = vrot.slane %v2062_v42, 3  ;;  %v6039_v42 = vld [vmem:[#allocation2 + $0x24] sm:$0xf] }
  0x95   : > { %5099 = vmatpush3.bf16.msra.mxu0 %v3320_v5  ;;  %5036 = vmatprep.mubr.msk.bf16.mxu0 %vm798_vm4, %v4566_v63  ;;  %v2059_v63 = vor.u32 %v2058_v59, %v2055_v52  ;;  %v2071_v5 = vshrl.u32 %v4544_v23, 16 }
  0x96   : > { %5211 = vmatprep.subr.msk.bf16.mxu0 %vm847_vm0, %v5953_v20  ;;  %v2068_v58 = vor.u32 %v2067_v2, %v2064_v36  ;;  %v4576_v36 = vcombine.low %v5968_v0, %v5972_v32  ;;  %v4632_v2 = vcombine.low %v6042_v60, %v6044_v57 }
  0x97   : > { %5007 = vmatmul.mubr.msk.bf16.gmra.mxu1 %vm798_vm4, %v2006_v50  ;;  %v2074_v50 = vshll.u32 %v4544_v23, 16  ;;  %v2060_v12 = vsel %vm1015_vm5, %v2050_v41, %v2059_v63  ;;  %v2073_v30 = vrot.slane %v2071_v5, 3  ;;  %v3001_v41 = vld [vmem:[#allocation2 + $0x20] sm:$0x8] }
  0x98   : > { %5010 = vmatprep.mubr.msk.bf16.mxu1 %vm798_vm4, %v2015_v25  ;;  %v6010_v25 = vld [vmem:[#allocation2 + $0x90] sm:$0xf]  ;;  %v2069_v4 = vsel %vm1015_vm5, %v2059_v63, %v2068_v58  ;;  %v4631_v23 = vcombine.low %v3001_v41, %v6039_v42  ;;  %v2669_v63 = vshrl.u32 %v5338_v49, 16  ;;  %v3128_v32 = vshrl.u32 %v4632_v2, 16  ;;  %v6095_v41 = vld [vmem:[#allocation2 + $0x4c] sm:$0xf] }
  0x99   : > { %v2076_v18 = vrot.slane %v2074_v50, 4  ;;  %v4546_v19 = vcombine.low %v6010_v25, %v6010_v25  ;;  %v2677_v50 = vshrl.u32 %v5339_v47, 16  ;;  %v3131_v10 = vshll.u32 %v4632_v2, 16 }
  0x9a   : > { %v3123_v0 = vshll.u32 %v4631_v23, 16  ;;  %v3130_v33 = vrot.slane %v3128_v32, 3  ;;  %v4579_v47 = vcombine.low %v5996_v6, %v6010_v25  ;;  %v6110_v32 = vld [vmem:[#allocation2 + $0x50] sm:$0xf] }
  0x9b   : > { %v2077_v26 = vor.u32 %v2076_v18, %v2073_v30  ;;  %v6066_v30 = vld [vmem:[#allocation2 + $0x38] sm:$0xf]  ;;  %v6068_v18 = vld [vmem:[#allocation2 + $0x3c] sm:$0xf]  ;;  %v3133_v43 = vrot.slane %v3131_v10, 4 }
  0x9c   : > { %5037 = vmatmul.mubr.msk.bf16.gmra.mxu0 %vm798_vm4, %v4567_v21  ;;  %v2082_v21 = vrot.slane %v2080_v1, 3  ;;  %v6060_v1 = vld [vmem:[#allocation2 + $0x34] sm:$0xf]  ;;  %v3125_v37 = vrot.slane %v3123_v0, 4 }
  0x9d   : > { %5040 = vmatprep.mubr.msk.bf16.mxu0 %vm798_vm4, %v4568_v29  ;;  %v2089_v29 = vshrl.u32 %v4546_v19, 16  ;;  %v2078_v34 = vsel %vm1015_vm5, %v2068_v58, %v2077_v26  ;;  %v3134_v40 = vor.u32 %v3133_v43, %v3130_v33  ;;  %v6112_v10 = vld [vmem:[#allocation2 + $0x54] sm:$0xf] }
  0x9e   : > { %v2086_v39 = vor.u32 %v2085_v24, %v2082_v21  ;;  %v2679_v21 = vor.u32 %v2677_v50, %v2675_v54 }
  0x9f   : > { %5011 = vmatmul.mubr.msk.bf16.gmra.mxu1 %vm798_vm4, %v2024_v35  ;;  %v2092_v35 = vshll.u32 %v4546_v19, 16  ;;  %v2091_v46 = vrot.slane %v2089_v29, 3 }
  0xa0   : > { %5014 = vmatprep.mubr.msk.bf16.mxu1 %vm798_vm4, %v2033_v16  ;;  %v2660_v16 = vshll.u32 %v5337_v62, 16  ;;  %v2087_v27 = vsel %vm1015_vm5, %v2077_v26, %v2086_v39  ;;  %v6072_v62 = vld [vmem:[#allocation2 + $0x3c] sm:$0xff]   ;;  %v4634_v26 = vcombine.low %v6066_v30, %v6068_v18 }
  0xa1   : > { %v2094_v17 = vrot.slane %v2092_v35, 4  ;;  %v2701_v6 = vshrl.u32 %v6072_v62, 16 }
  0xa2   : > { %v2662_v13 = vrot.slane %v2660_v16, 1  ;;  %v2697_v16 = vshll.u32 %v6072_v62, 16 }
  0xa4   : > { %5041 = vmatmul.mubr.msk.bf16.gmra.mxu0 %vm798_vm4, %v4569_v14  ;;  %v2665_v14 = vshll.u32 %v5338_v49, 16  ;;  %v2663_v52 = vor.u32 %v2662_v13, %v2658_v7  ;;  %v5349_v7 = vld [vmem:[#allocation2 + $0x44] sm:$0xff]   ;;  %v4635_v13 = vcombine.low %v6079_v38, %v6085_v44 }
  0xa5   : > { %5044 = vmatprep.mubr.msk.bf16.mxu0 %vm798_vm4, %v4570_v45  ;;  %v2095_v45 = vor.u32 %v2094_v17, %v2091_v46  ;;  %v3146_v17 = vshrl.u32 %v4634_v26, 16  ;;  %v2705_v56 = vshll.u32 %v5349_v7, 16  ;;  %v2709_v50 = vshrl.u32 %v5349_v7, 16 }
  0xa6   : > { %v2667_v59 = vrot.slane %v2665_v14, 1  ;;  %v6093_v14 = vld [vmem:[#allocation2 + $0x48] sm:$0xf] }
  0xa7   : > { %5015 = vmatmul.mubr.msk.bf16.gmra.mxu1 %vm798_vm4, %v2042_v51  ;;  %v4575_v51 = vcombine.low %v5943_v15, %v5966_v28  ;;  %v6057_v15 = vld [vmem:[#allocation2 + $0x30] sm:$0xf]  ;;  %v3120_v28 = vshrl.u32 %v4631_v23, 16 }
  0xa8   : > { %5018 = vmatprep.mubr.msk.bf16.mxu1 %vm798_vm4, %v2051_v55  ;;  %v5344_v55 = vld [vmem:[#allocation2 + $0x2c] sm:$0xff]   ;;  %v2668_v5 = vsel %vm1482_vm6, %v2663_v52, %v2667_v59  ;;  %v4633_v19 = vcombine.low %v6057_v15, %v6060_v1 }
  0xa9   : > { %v2681_v58 = vshll.u32 %v5344_v55, 16  ;;  %v2685_v35 = vshrl.u32 %v5344_v55, 16  ;;  %v6099_v52 = vld [vmem:[#allocation2 + $0x4c] sm:$0xff]  }
  0xab   : > { %v2683_v24 = vrot.slane %v2681_v58, 1  ;;  %v2713_v58 = vshll.u32 %v6099_v52, 16 }
  0xac   : > { %5045 = vmatmul.mubr.msk.bf16.gmra.mxu0 %vm798_vm4, %v4571_v61  ;;  %v2096_v61 = vsel %vm1015_vm5, %v2086_v39, %v2095_v45  ;;  %v3550_v39 = vsel %vm847_vm0, %v5906_v22, 0 }
  0xad   : > { %5048 = vmatprep.mubr.msk.bf16.mxu0 %vm798_vm4, %v4572_v48  ;;  %v5345_v48 = vld [vmem:[#allocation2 + $0x34] sm:$0xff]   ;;  %v2684_v49 = vsel %vm1482_vm6, %v2679_v21, %v2683_v24  ;;  %v2687_v22 = vor.u32 %v2685_v35, %v2683_v24  ;;  %v6117_v21 = vld [vmem:[#allocation2 + $0x5c] sm:$0xf]  ;;  %v2715_v43 = vrot.slane %v2713_v58, 1 }
  0xae   : > { %v2693_v9 = vshrl.u32 %v5345_v48, 16 }
  0xaf   : > { %5019 = vmatmul.mubr.msk.bf16.gmra.mxu1 %vm798_vm4, %v2060_v12  ;;  %v2671_v12 = vor.u32 %v2669_v63, %v2667_v59 }
  0xb0   : > { %5022 = vmatprep.mubr.msk.bf16.mxu1 %vm798_vm4, %v2069_v4  ;;  %v3122_v4 = vrot.slane %v3120_v28, 3  ;;  %v3158_v28 = vshll.u32 %v4635_v13, 16 }
  0xb1   : > { %v2676_v29 = vsel %vm1482_vm6, %v2671_v12, %v2675_v54  ;;  %v6114_v54 = vld [vmem:[#allocation2 + $0x58] sm:$0xf] }
  0xb2   : > { %v3126_v53 = vor.u32 %v3125_v37, %v3122_v4  ;;  %v5353_v4 = vld [vmem:[#allocation2 + $0x54] sm:$0xff]   ;;  %v3160_v62 = vrot.slane %v3158_v28, 4  ;;  %v4637_v37 = vcombine.low %v6110_v32, %v6112_v10  ;;  %v4638_v35 = vcombine.low %v6114_v54, %v6117_v21 }
  0xb4   : > { %5049 = vmatmul.mubr.msk.bf16.gmra.mxu0 %vm798_vm4, %v4573_v11  ;;  %v2689_v11 = vshll.u32 %v5345_v48, 16  ;;  %v3135_v59 = vsel %vm1015_vm5, %v3126_v53, %v3134_v40  ;;  %v3182_v7 = vshrl.u32 %v4638_v35, 16 }
  0xb5   : > { %5052 = vmatprep.mubr.msk.bf16.mxu0 %vm798_vm4, %v4574_v3  ;;  %v3137_v3 = vshrl.u32 %v4633_v19, 16 }
  0xb6   : > { %v2691_v46 = vrot.slane %v2689_v11, 1  ;;  %v6122_v11 = vld [vmem:[#allocation2 + $0x5c] sm:$0xff]   ;;  %v3184_v28 = vrot.slane %v3182_v7, 3 }
  0xb7   : > { %5023 = vmatmul.mubr.msk.bf16.gmra.mxu1 %vm798_vm4, %v2078_v34  ;;  %v3140_v34 = vshll.u32 %v4633_v19, 16  ;;  %v3139_v23 = vrot.slane %v3137_v3, 3 }
  0xb8   : > { %5026 = vmatprep.mubr.msk.bf16.mxu1 %vm798_vm4, %v2087_v27  ;;  %v3149_v27 = vshll.u32 %v4634_v26, 16  ;;  %v2695_v45 = vor.u32 %v2693_v9, %v2691_v46  ;;  %v2692_v63 = vsel %vm1482_vm6, %v2687_v22, %v2691_v46  ;;  %v3173_v46 = vshrl.u32 %v4637_v37, 16 }
  0xb9   : > { %v3142_v55 = vrot.slane %v3140_v34, 4  ;;  %v2717_v34 = vshrl.u32 %v6099_v52, 16  ;;  %v3185_v22 = vshll.u32 %v4638_v35, 16  ;;  %v5357_v52 = vld [vmem:[#allocation2 + $0x64] sm:$0xff]   ;;  %v5361_v35 = vld [vmem:[#allocation2 + $0x74] sm:$0xff]  }
  0xba   : > { %v3151_v2 = vrot.slane %v3149_v27, 4  ;;  %v3176_v27 = vshll.u32 %v4637_v37, 16  ;;  %v2737_v58 = vshll.u32 %v5357_v52, 16 }
  0xbb   : > { %v3143_v0 = vor.u32 %v3142_v55, %v3139_v23  ;;  %v6142_v23 = vld [vmem:[#allocation2 + $0x68] sm:$0xf]  ;;  %v6144_v55 = vld [vmem:[#allocation2 + $0x6c] sm:$0xf] }
  0xbc   : > { %5053 = vmatmul.mubr.msk.bf16.gmra.mxu0 %vm798_vm4, %v4575_v51  ;;  %v2699_v51 = vrot.slane %v2697_v16, 1  ;;  %v2721_v16 = vshll.u32 %v5353_v4, 16 }
  0xbd   : > { %5056 = vmatprep.mubr.msk.bf16.mxu0 %vm798_vm4, %v4576_v36  ;;  %v3148_v36 = vrot.slane %v3146_v17, 3  ;;  %v3144_v26 = vsel %vm1015_vm5, %v3134_v40, %v3143_v0  ;;  %v2725_v17 = vshrl.u32 %v5353_v4, 16  ;;  %v6160_v4 = vld [vmem:[#allocation2 + $0x74] sm:$0xf] }
  0xbe   : > { %v2700_v25 = vsel %vm1482_vm6, %v2695_v45, %v2699_v51  ;;  %v6137_v45 = vld [vmem:[#allocation2 + $0x60] sm:$0xf] }
  0xbf   : > { %5027 = vmatmul.mubr.msk.bf16.gmra.mxu1 %vm798_vm4, %v2096_v61  ;;  %v4636_v61 = vcombine.low %v6093_v14, %v6095_v41  ;;  %v3152_v48 = vor.u32 %v3151_v2, %v3148_v36  ;;  %v3175_v2 = vrot.slane %v3173_v46, 3 }
  0xc0   : > { %5066 = vmatprep.mubr.msk.bf16.mxu1 %vm798_vm4, %v2668_v5  ;;  %v3155_v5 = vshrl.u32 %v4635_v13, 16 }
  0xc1   : > { %v3164_v12 = vshrl.u32 %v4636_v61, 16  ;;  %v3167_v19 = vshll.u32 %v4636_v61, 16 }
  0xc2   : > { %v3157_v24 = vrot.slane %v3155_v5, 3  ;;  %v3178_v5 = vrot.slane %v3176_v27, 4 }
  0xc3   : > { %v3169_v9 = vrot.slane %v3167_v19, 4  ;;  %v6158_v19 = vld [vmem:[#allocation2 + $0x70] sm:$0xf] }
  0xc4   : > { %5057 = vmatmul.mubr.msk.bf16.gmra.mxu0 %vm798_vm4, %v4577_v8  ;;  %v2707_v8 = vrot.slane %v2705_v56, 1  ;;  %v3161_v53 = vor.u32 %v3160_v62, %v3157_v24  ;;  %v2741_v24 = vshrl.u32 %v5357_v52, 16 }
  0xc5   : > { %5060 = vmatprep.mubr.msk.bf16.mxu0 %vm798_vm4, %v4578_v31  ;;  %v2703_v31 = vor.u32 %v2701_v6, %v2699_v51  ;;  %v6139_v51 = vld [vmem:[#allocation2 + $0x64] sm:$0xf]  ;;  %v3187_v6 = vrot.slane %v3185_v22, 4  ;;  %v2753_v22 = vshll.u32 %v5361_v35, 16 }
  0xc6   : > { %v2711_v33 = vor.u32 %v2709_v50, %v2707_v8  ;;  %v3162_v36 = vsel %vm1015_vm5, %v3152_v48, %v3161_v53 }
  0xc7   : > { %5067 = vmatmul.mubr.msk.bf16.vlgmr.msra.gmra.mxu1 %vm798_vm4, %v2676_v29  ;;  %v4012_v29 = vsel %vm847_vm0, %v5953_v20, 0  ;;  %v2708_v3 = vsel %vm1482_vm6, %v2703_v31, %v2707_v8  ;;  %v2729_v20 = vshll.u32 %v6122_v11, 16  ;;  %v3179_v31 = vor.u32 %v3178_v5, %v3175_v2 }
  0xc8   : > { %5133 = vmatpush3.bf16.msra.mxu1 %v3550_v39  ;;  %5070 = vmatprep.mubr.msk.bf16.mxu1 %vm798_vm4, %v2684_v49  ;;  %v3153_v39 = vsel %vm1015_vm5, %v3143_v0, %v3152_v48  ;;  %v3166_v49 = vrot.slane %v3164_v12, 3  ;;  %v2716_v40 = vsel %vm1482_vm6, %v2711_v33, %v2715_v43  ;;  %v4640_v0 = vcombine.low %v6142_v23, %v6144_v55 }
  0xc9   : > { %v2731_v61 = vrot.slane %v2729_v20, 1  ;;  %v2733_v48 = vshrl.u32 %v6122_v11, 16  ;;  %v3188_v37 = vor.u32 %v3187_v6, %v3184_v28  ;;  %v2739_v11 = vrot.slane %v2737_v58, 1  ;;  %v6188_v58 = vld [vmem:[#allocation2 + $0x88] sm:$0xf] }
  0xca   : > { %v3170_v13 = vor.u32 %v3169_v9, %v3166_v49  ;;  %v4641_v49 = vcombine.low %v6158_v19, %v6160_v4  ;;  %v6168_v9 = vld [vmem:[#allocation2 + $0x78] sm:$0xf] }
  0xcc   : > { %5061 = vmatmul.mubr.msk.bf16.gmra.mxu0 %vm798_vm4, %v4579_v47  ;;  %v2723_v47 = vrot.slane %v2721_v16, 1  ;;  %v3171_v50 = vsel %vm1015_vm5, %v3161_v53, %v3170_v13  ;;  %v6170_v16 = vld [vmem:[#allocation2 + $0x7c] sm:$0xf]  ;;  %v2743_v53 = vor.u32 %v2741_v24, %v2739_v11  ;;  %v3180_v46 = vsel %vm1015_vm5, %v3170_v13, %v3179_v31 }
  0xcd   : > { %5100 = vmatprep.mubr.msk.bf16.mxu0 %vm798_vm4, %v3135_v59  ;;  %v2719_v59 = vor.u32 %v2717_v34, %v2715_v43  ;;  %v6172_v34 = vld [vmem:[#allocation2 + $0x7c] sm:$0xff]   ;;  %v3212_v2 = vshll.u32 %v4641_v49, 16 }
  0xce   : > { %v2727_v56 = vor.u32 %v2725_v17, %v2723_v47  ;;  %v2761_v5 = vshll.u32 %v6172_v34, 16 }
  0xcf   : > { %5071 = vmatmul.mubr.msk.bf16.gmra.mxu1 %vm798_vm4, %v2692_v63  ;;  %v6147_v63 = vld [vmem:[#allocation2 + $0x6c] sm:$0xff]   ;;  %v2724_v8 = vsel %vm1482_vm6, %v2719_v59, %v2723_v47  ;;  %v4642_v47 = vcombine.low %v6168_v9, %v6170_v16  ;;  %v3209_v59 = vshrl.u32 %v4641_v49, 16 }
  0xd0   : > { %5074 = vmatprep.mubr.msk.bf16.mxu1 %vm798_vm4, %v2700_v25  ;;  %v4639_v25 = vcombine.low %v6137_v45, %v6139_v51  ;;  %v2732_v12 = vsel %vm1482_vm6, %v2727_v56, %v2731_v61  ;;  %v2745_v62 = vshll.u32 %v6147_v63, 16  ;;  %v6182_v56 = vld [vmem:[#allocation2 + $0x80] sm:$0xf] }
  0xd2   : > { %v3191_v33 = vshrl.u32 %v4639_v25, 16  ;;  %v3194_v43 = vshll.u32 %v4639_v25, 16  ;;  %v6186_v25 = vld [vmem:[#allocation2 + $0x84] sm:$0xf] }
  0xd4   : > { %5101 = vmatmul.mubr.msk.bf16.vlgmr.msra.gmra.mxu0 %vm798_vm4, %v3144_v26  ;;  %v3200_v26 = vshrl.u32 %v4640_v0, 16  ;;  %v3193_v17 = vrot.slane %v3191_v33, 3  ;;  %v3196_v20 = vrot.slane %v3194_v43, 4  ;;  %v3214_v33 = vrot.slane %v3212_v2, 4 }
  0xd5   : > { %5167 = vmatpush3.bf16.msra.mxu0 %v4012_v29  ;;  %5104 = vmatprep.mubr.msk.bf16.mxu0 %vm798_vm4, %v3153_v39  ;;  %v3203_v29 = vshll.u32 %v4640_v0, 16  ;;  %v2735_v39 = vor.u32 %v2733_v48, %v2731_v61  ;;  %v2757_v61 = vshrl.u32 %v5361_v35, 16  ;;  %v2755_v0 = vrot.slane %v2753_v22, 1 }
  0xd6   : > { %v3202_v27 = vrot.slane %v3200_v26, 3  ;;  %v3197_v28 = vor.u32 %v3196_v20, %v3193_v17  ;;  %v3221_v48 = vshll.u32 %v4642_v47, 16  ;;  %v6196_v26 = vld [vmem:[#allocation2 + $0x8c] sm:$0xff]  }
  0xd7   : > { %5075 = vmatmul.mubr.msk.bf16.gmra.mxu1 %vm798_vm4, %v2708_v3  ;;  %v2747_v3 = vrot.slane %v2745_v62, 1  ;;  %v3205_v7 = vrot.slane %v3203_v29, 4  ;;  %v2740_v52 = vsel %vm1482_vm6, %v2735_v39, %v2739_v11  ;;  %v2759_v43 = vor.u32 %v2757_v61, %v2755_v0  ;;  %v6212_v61 = vld [vmem:[#allocation2 + $0x90] sm:$0xf] }
  0xd8   : > { %5078 = vmatprep.mubr.msk.bf16.mxu1 %vm798_vm4, %v2716_v40  ;;  %v3189_v40 = vsel %vm1015_vm5, %v3179_v31, %v3188_v37  ;;  %v3211_v31 = vrot.slane %v3209_v59, 3  ;;  %v2763_v11 = vrot.slane %v2761_v5, 1  ;;  %v3198_v29 = vsel %vm1015_vm5, %v3188_v37, %v3197_v28 }
  0xd9   : > { %v2748_v13 = vsel %vm1482_vm6, %v2743_v53, %v2747_v3  ;;  %v4643_v39 = vcombine.low %v6182_v56, %v6186_v25 }
  0xda   : > { %v3215_v37 = vor.u32 %v3214_v33, %v3211_v31 }
  0xdb   : > { %v3227_v59 = vshrl.u32 %v4643_v39, 16 }
  0xdc   : > { %5105 = vmatmul.mubr.msk.bf16.gmra.mxu0 %vm798_vm4, %v3162_v36  ;;  %v2749_v36 = vshrl.u32 %v6147_v63, 16  ;;  %v3206_v63 = vor.u32 %v3205_v7, %v3202_v27  ;;  %v2765_v27 = vshrl.u32 %v6172_v34, 16  ;;  %v2764_v7 = vsel %vm1482_vm6, %v2759_v43, %v2763_v11 }
  0xdd   : > { %5108 = vmatprep.mubr.msk.bf16.mxu0 %vm798_vm4, %v3171_v50  ;;  %v5365_v50 = vld [vmem:[#allocation2 + $0x84] sm:$0xff]  }
  0xde   : > { %v2751_v62 = vor.u32 %v2749_v36, %v2747_v3  ;;  %v2769_v49 = vshll.u32 %v5365_v50, 16  ;;  %v3223_v3 = vrot.slane %v3221_v48, 4  ;;  %v2773_v22 = vshrl.u32 %v5365_v50, 16  ;;  %v6222_v48 = vld [vmem:[#allocation2 + $0x9c] sm:$0xf] }
  0xdf   : > { %5079 = vmatmul.mubr.msk.bf16.gmra.mxu1 %vm798_vm4, %v2724_v8  ;;  %v3218_v8 = vshrl.u32 %v4642_v47, 16  ;;  %v2777_v47 = vshll.u32 %v6196_v26, 16  ;;  %v3230_v36 = vshll.u32 %v4643_v39, 16  ;;  %v2767_v50 = vor.u32 %v2765_v27, %v2763_v11 }
  0xe0   : > { %5082 = vmatprep.mubr.msk.bf16.mxu1 %vm798_vm4, %v2732_v12  ;;  %v6191_v12 = vld [vmem:[#allocation2 + $0x8c] sm:$0xf]  ;;  %v2756_v20 = vsel %vm1482_vm6, %v2751_v62, %v2755_v0  ;;  %v2771_v2 = vrot.slane %v2769_v49, 1  ;;  %v3216_v33 = vsel %vm1015_vm5, %v3206_v63, %v3215_v37 }
  0xe1   : > { %v4644_v53 = vcombine.low %v6188_v58, %v6191_v12  ;;  %v2779_v31 = vrot.slane %v2777_v47, 1 }
  0xe2   : > { %v2775_v62 = vor.u32 %v2773_v22, %v2771_v2 }
  0xe3   : > { %v3239_v5 = vshll.u32 %v4644_v53, 16 }
  0xe4   : > { %5109 = vmatmul.mubr.msk.bf16.gmra.mxu0 %vm798_vm4, %v3180_v46  ;;  %v3207_v46 = vsel %vm1015_vm5, %v3197_v28, %v3206_v63  ;;  %v6215_v28 = vld [vmem:[#allocation2 + $0x94] sm:$0xf] }
  0xe5   : > { %5112 = vmatprep.mubr.msk.bf16.mxu0 %vm798_vm4, %v3189_v40  ;;  %v3220_v40 = vrot.slane %v3218_v8, 3  ;;  %v6220_v8 = vld [vmem:[#allocation2 + $0x98] sm:$0xf]  ;;  %v4645_v39 = vcombine.low %v6212_v61, %v6215_v28 }
  0xe6   : > { %v4646_v11 = vcombine.low %v6220_v8, %v6222_v48 }
  0xe7   : > { %v4914_v6 = vpop.f32.mrf.mxu1  ;;  %5083 = vmatmul.mubr.msk.bf16.gmra.mxu1 %vm798_vm4, %v2740_v52  ;;  %v3224_v34 = vor.u32 %v3223_v3, %v3220_v40  ;;  %v2772_v3 = vsel %vm1482_vm6, %v2767_v50, %v2771_v2  ;;  %v3245_v22 = vshrl.u32 %v4645_v39, 16  ;;  %v3248_v47 = vshll.u32 %v4645_v39, 16 }
  0xe8   : > { %5086 = vmatprep.mubr.msk.bf16.mxu1 %vm798_vm4, %v2748_v13  ;;  %v3236_v13 = vshrl.u32 %v4644_v53, 16  ;;  %v5369_v6 = vld [vmem:[#allocation2 + $0x94] ss:$0 sps:$4 sm:$0x11]   ;;  %v3254_v2 = vshrl.u32 %v4646_v11, 16 }
  0xe9   : > { %v6193_v24 = vpop.f32.mrf.mxu1  ;;  %v3225_v49 = vsel %vm1015_vm5, %v3215_v37, %v3224_v34  ;;  %v2785_v63 = vshll.u32 %v5369_v6, 16 }
  0xea   : > { %v3238_v53 = vrot.slane %v3236_v13, 3  ;;  %v3257_v13 = vshll.u32 %v4646_v11, 16 }
  0xeb   : > { %v4915_v35 = vpop.f32.mrf.mxu1  ;;  %v2787_v6 = vrot.slane %v2785_v63, 1 }
  0xec   : > { %5113 = vmatmul.mubr.msk.bf16.gmra.mxu0 %vm798_vm4, %v3198_v29  ;;  %v3229_v29 = vrot.slane %v3227_v59, 3  ;;  %v3232_v35 = vrot.slane %v3230_v36, 4  ;;  %v3259_v11 = vrot.slane %v3257_v13, 4 }
  0xed   : > { %v6204_v17 = vpop.f32.mrf.mxu1  ;;  %5116 = vmatprep.mubr.msk.bf16.mxu0 %vm798_vm4, %v3207_v46  ;;  %v3241_v46 = vrot.slane %v3239_v5, 4 }
  0xee   : > { %v3233_v37 = vor.u32 %v3232_v35, %v3229_v29  ;;  %v3250_v29 = vrot.slane %v3248_v47, 4 }
  0xef   : > { %v4918_v52 = vpop.f32.mrf.mxu1  ;;  %5087 = vmatmul.mubr.msk.bf16.gmra.mxu1 %vm798_vm4, %v2756_v20  ;;  %v2781_v20 = vshrl.u32 %v6196_v26, 16  ;;  %v3242_v36 = vor.u32 %v3241_v46, %v3238_v53  ;;  %v6240_v26 = vld [vmem:[#allocation2 + $0xa0] sm:$0xf]  ;;  %v3256_v46 = vrot.slane %v3254_v2, 3  ;;  %v5373_v2 = vld [vmem:[#allocation2 + $0x2c] sm:$0xff]  }
  0xf0   : > { %5090 = vmatprep.mubr.msk.bf16.mxu1 %vm798_vm4, %v2764_v7  ;;  %v2780_v7 = vsel %vm1482_vm6, %v2775_v62, %v2779_v31  ;;  %v4647_v35 = vcombine.low %v6240_v26, %v6240_v26 }
  0xf1   : > { %v6217_v0 = vpop.f32.mrf.mxu1  ;;  %v2783_v5 = vor.u32 %v2781_v20, %v2779_v31  ;;  %v4665_v20 = vcombine.low %v6039_v42, %v6042_v60 }
  0xf3   : > { %v4919_v43 = vpop.f32.mrf.mxu1  ;;  %v2788_v31 = vsel %vm1482_vm6, %v2783_v5, %v2787_v6  ;;  %v4666_v5 = vcombine.low %v6044_v57, %v6057_v15  ;;  %v5374_v57 = vld [vmem:[#allocation2 + $0x34] sm:$0xff]  }
  0xf4   : > { %v4898_v27 = vpop.f32.mrf.mxu0  ;;  %5117 = vmatmul.mubr.msk.bf16.gmra.mxu0 %vm798_vm4, %v3216_v33  ;;  %v3234_v33 = vsel %vm1015_vm5, %v3224_v34, %v3233_v37  ;;  %v3247_v43 = vrot.slane %v3245_v22, 3  ;;  %v3266_v22 = vshll.u32 %v4647_v35, 16 }
  0xf5   : > { %v6230_v40 = vpop.f32.mrf.mxu1  ;;  %5120 = vmatprep.mubr.msk.bf16.mxu0 %vm798_vm4, %v3225_v49  ;;  %v3243_v49 = vsel %vm1015_vm5, %v3233_v37, %v3242_v36 }
  0xf6   : > { %v6237_v52 = vpop.f32.mrf.mxu0  ;;  %v3251_v27 = vor.u32 %v3250_v29, %v3247_v43 }
  0xf7   : > { %v4922_v59 = vpop.f32.mrf.mxu1  ;;  %5091 = vmatmul.mubr.msk.bf16.gmra.mxu1 %vm798_vm4, %v2772_v3  ;;  %v5372_v3 = vld [vmem:[#allocation2 + $0x24] sm:$0xff]  }
  0xf8   : > { %5094 = vmatprep.mubr.msk.bf16.mxu1 %vm798_vm4, %v2780_v7  ;;  %v4899_v50 = vpop.f32.mrf.mxu0  ;;  %v3263_v7 = vshrl.u32 %v4647_v35, 16  ;;  %v3260_v59 = vor.u32 %v3259_v11, %v3256_v46  ;;  %v3834_v13 = vshll.u32 %v5372_v3, 16  ;;  %v3252_v6 = vsel %vm1015_vm5, %v3242_v36, %v3251_v27 }
  0xf9   : > { %v6243_v62 = vpop.f32.mrf.mxu1  ;;  %v3839_v46 = vshll.u32 %v5373_v2, 16  ;;  %v4667_v11 = vcombine.low %v6060_v1, %v6066_v30 }
  0xfa   : > { %v6248_v39 = vpop.f32.mrf.mxu0  ;;  %v3265_v50 = vrot.slane %v3263_v7, 3  ;;  %v3261_v29 = vsel %vm1015_vm5, %v3251_v27, %v3260_v59  ;;  %v5375_v7 = vld [vmem:[#allocation2 + $0x3c] sm:$0xff]  }
  0xfb   : > { %v4923_v53 = vpop.f32.mrf.mxu1  ;;  %v3841_v27 = vrot.slane %v3839_v46, 1 }
  0xfc   : > { %v4902_v63 = vpop.f32.mrf.mxu0  ;;  %5121 = vmatmul.mubr.msk.bf16.gmra.mxu0 %vm798_vm4, %v3234_v33  ;;  %v3268_v33 = vrot.slane %v3266_v22, 4  ;;  %v3836_v53 = vrot.slane %v3834_v13, 1  ;;  %v3847_v22 = vshll.u32 %v5374_v57, 16 }
  0xfd   : > { %v6255_v34 = vpop.f32.mrf.mxu1  ;;  %5124 = vmatprep.mubr.msk.bf16.mxu0 %vm798_vm4, %v3243_v49  ;;  %v3832_v49 = vshrl.u32 %v5372_v3, 16 }
  0xfe   : > { %v6258_v37 = vpop.f32.mrf.mxu0  ;;  %v3269_v15 = vor.u32 %v3268_v33, %v3265_v50 }
  0xff   : > { %v4926_v47 = vpop.f32.mrf.mxu1  ;;  %5095 = vmatmul.mubr.msk.bf16.gmra.mxu1 %vm798_vm4, %v2788_v31  ;;  %v3837_v3 = vor.u32 %v3836_v53, %v3832_v49  ;;  %v4669_v49 = vcombine.low %v6085_v44, %v6093_v14 }
 0x100   : > { %5134 = vmatprep.mubr.msk.bf16.mxu1 %vm798_vm4, %v4665_v20  ;;  %v4903_v42 = vpop.f32.mrf.mxu0  ;;  %v3270_v47 = vsel %vm1015_vm5, %v3260_v59, %v3269_v15  ;;  %v3849_v59 = vrot.slane %v3847_v22, 1 }
 0x101   : > { %v6262_v60 = vpop.f32.mrf.mxu1  ;;  %v3843_v42 = vshrl.u32 %v5373_v2, 16  ;;  %v3842_v50 = vsel %vm1482_vm6, %v3837_v3, %v3841_v27 }
 0x102   : > { %v6267_v43 = vpop.f32.mrf.mxu0 }
 0x103   : > { %v4927_v35 = vpop.f32.mrf.mxu1  ;;  %v3845_v2 = vor.u32 %v3843_v42, %v3841_v27 }
 0x104   : > { %v4906_v31 = vpop.f32.mrf.mxu0  ;;  %5125 = vmatmul.mubr.msk.bf16.gmra.mxu0 %vm798_vm4, %v3252_v6  ;;  %v3855_v35 = vshll.u32 %v5375_v7, 16 }
 0x105   : > { %v6273_v20 = vpop.f32.mrf.mxu1  ;;  %5128 = vmatprep.mubr.msk.bf16.mxu0 %vm798_vm4, %v3261_v29  ;;  %v3851_v29 = vshrl.u32 %v5374_v57, 16  ;;  %v5377_v57 = vld [vmem:[#allocation2 + $0x4c] sm:$0xff]   ;;  %v3850_v3 = vsel %vm1482_vm6, %v3845_v2, %v3849_v59 }
 0x106   : > { %v6276_v36 = vpop.f32.mrf.mxu0 }
 0x107   : > { %v4932_v63 = vpop.f32.mrf.mxu1  ;;  %5135 = vmatmul.mubr.msk.bf16.vlgmr.msra.gmra.mxu1 %vm798_vm4, %v4666_v5  ;;  %v4668_v5 = vcombine.low %v6068_v18, %v6079_v38  ;;  %v3853_v18 = vor.u32 %v3851_v29, %v3849_v59  ;;  %v3857_v38 = vrot.slane %v3855_v35, 1 }
 0x108   : > { %5138 = vmatprep.mubr.msk.bf16.mxu1 %vm798_vm4, %v4667_v11  ;;  %v4907_v1 = vpop.f32.mrf.mxu0 }
 0x109   : > { %v1253_v30 = vpop.f32.mrf.mxu1  ;;  %v3859_v1 = vshrl.u32 %v5375_v7, 16 }
 0x10a   : > { %v1254_v13 = vadd.f32 %v1253_v30, %v6237_v52  ;;  %v6282_v6 = vpop.f32.mrf.mxu0  ;;  %v5376_v52 = vld [vmem:[#allocation2 + $0x44] sm:$0xff]  }
 0x10b   : > { %v4933_v33 = vpop.f32.mrf.mxu1  ;;  %v3863_v63 = vshll.u32 %v5376_v52, 16  ;;  %v3867_v42 = vshrl.u32 %v5376_v52, 16  ;;  %v3861_v7 = vor.u32 %v3859_v1, %v3857_v38 }
 0x10c   : > { %v4910_v53 = vpop.f32.mrf.mxu0  ;;  %5129 = vmatmul.mubr.msk.bf16.gmra.mxu0 %vm798_vm4, %v3270_v47  ;;  %v4670_v47 = vcombine.low %v6095_v41, %v6110_v32  ;;  %v4671_v33 = vcombine.low %v6112_v10, %v6114_v54 }
 0x10d   : > { %v1256_v46 = vpop.f32.mrf.mxu1  ;;  %5168 = vmatprep.mubr.msk.bf16.mxu0 %vm798_vm4, %v3842_v50  ;;  %v3871_v50 = vshll.u32 %v5377_v57, 16  ;;  %v3865_v29 = vrot.slane %v3863_v63, 1  ;;  %v4672_v63 = vcombine.low %v6117_v21, %v6137_v45 }
 0x10e   : > { %v1257_v11 = vadd.f32 %v1256_v46, %v6248_v39  ;;  %v6292_v31 = vpop.f32.mrf.mxu0  ;;  %v3858_v39 = vsel %vm1482_vm6, %v3853_v18, %v3857_v38  ;;  %v5379_v46 = vld [vmem:[#allocation2 + $0x5c] sm:$0xff]   ;;  %v3875_v38 = vshrl.u32 %v5377_v57, 16  ;;  %v5380_v57 = vld [vmem:[#allocation2 + $0x64] sm:$0xff]  }
 0x10f   : > { %v4936_v15 = vpop.f32.mrf.mxu1  ;;  %5139 = vmatmul.mubr.msk.bf16.gmra.mxu1 %vm798_vm4, %v4668_v5  ;;  %v3869_v41 = vor.u32 %v3867_v42, %v3865_v29  ;;  %v3873_v32 = vrot.slane %v3871_v50, 1 }
 0x110   : > { %5142 = vmatprep.mubr.msk.bf16.mxu1 %vm798_vm4, %v4669_v49  ;;  %v4911_v44 = vpop.f32.mrf.mxu0  ;;  %v3866_v15 = vsel %vm1482_vm6, %v3861_v7, %v3865_v29 }
 0x111   : > { %v1267_v14 = vpop.f32.mrf.mxu1  ;;  %v3874_v44 = vsel %vm1482_vm6, %v3869_v41, %v3873_v32  ;;  %v3877_v42 = vor.u32 %v3875_v38, %v3873_v32  ;;  %v4674_v32 = vcombine.low %v6144_v55, %v6158_v19 }
 0x112   : > { %v1268_v27 = vadd.f32 %v1267_v14, %v6258_v37  ;;  %v6298_v30 = vpop.f32.mrf.mxu0  ;;  %v5378_v37 = vld [vmem:[#allocation2 + $0x54] sm:$0xff]  }
 0x113   : > { %v4937_v22 = vpop.f32.mrf.mxu1  ;;  %v3879_v2 = vshll.u32 %v5378_v37, 16 }
 0x114   : > { %v4966_v5 = vpop.f32.mrf.mxu0  ;;  %5169 = vmatmul.mubr.msk.bf16.vlgmr.msra.gmra.mxu0 %vm798_vm4, %v3850_v3  ;;  %v3883_v3 = vshrl.u32 %v5378_v37, 16 }
 0x115   : > { %v1270_v35 = vpop.f32.mrf.mxu1  ;;  %5172 = vmatprep.mubr.msk.bf16.mxu0 %vm798_vm4, %v3858_v39  ;;  %v4673_v39 = vcombine.low %v6139_v51, %v6142_v23  ;;  %v5381_v5 = vld [vmem:[#allocation2 + $0x6c] sm:$0xff]  }
 0x116   : > { %v1271_v49 = vadd.f32 %v1270_v35, %v6267_v43  ;;  %v1700_v53 = vpop.f32.mrf.mxu0  ;;  %v3895_v35 = vshll.u32 %v5380_v57, 16 }
 0x117   : > { %v4940_v59 = vpop.f32.mrf.mxu1  ;;  %5143 = vmatmul.mubr.msk.bf16.gmra.mxu1 %vm798_vm4, %v4670_v47  ;;  %v6309_v52 = vadd.f32 %v1700_v53, %v1254_v13  ;;  %v3887_v13 = vshll.u32 %v5379_v46, 16  ;;  %v3881_v47 = vrot.slane %v3879_v2, 1  ;;  %v3891_v53 = vshrl.u32 %v5379_v46, 16  ;;  %v5382_v46 = vld [vmem:[#allocation2 + $0x74] sm:$0xff]  }
 0x118   : > { %5146 = vmatprep.mubr.msk.bf16.mxu1 %vm798_vm4, %v4671_v33  ;;  %v4967_v10 = vpop.f32.mrf.mxu0  ;;  %v4675_v2 = vcombine.low %v6160_v4, %v6168_v9  ;;  %v3897_v38 = vrot.slane %v3895_v35, 1 }
 0x119   : > { %v1281_v54 = vpop.f32.mrf.mxu1  ;;  %v3885_v45 = vor.u32 %v3883_v3, %v3881_v47  ;;  %v3882_v37 = vsel %vm1482_vm6, %v3877_v42, %v3881_v47  ;;  %v3899_v10 = vshrl.u32 %v5380_v57, 16  ;;  %v3907_v47 = vshrl.u32 %v5381_v5, 16 }
 0x11a   : > { %v1282_v18 = vadd.f32 %v1281_v54, %v6276_v36  ;;  %v1703_v43 = vpop.f32.mrf.mxu0  ;;  %v4676_v42 = vcombine.low %v6170_v16, %v6182_v56 }
 0x11b   : > { %v4941_v14 = vpop.f32.mrf.mxu1  ;;  %v6317_v1 = vadd.f32 %v1703_v43, %v1257_v11  ;;  %v3889_v11 = vrot.slane %v3887_v13, 1  ;;  %v3901_v19 = vor.u32 %v3899_v10, %v3897_v38  ;;  %v3911_v13 = vshll.u32 %v5382_v46, 16 }
 0x11c   : > { %v4970_v22 = vpop.f32.mrf.mxu0  ;;  %5173 = vmatmul.mubr.msk.bf16.gmra.mxu0 %vm798_vm4, %v3866_v15 }
 0x11d   : > { %v1284_v36 = vpop.f32.mrf.mxu1  ;;  %5176 = vmatprep.mubr.msk.bf16.mxu0 %vm798_vm4, %v3874_v44  ;;  %v3890_v59 = vsel %vm1482_vm6, %v3885_v45, %v3889_v11  ;;  %v3893_v43 = vor.u32 %v3891_v53, %v3889_v11  ;;  %v4677_v45 = vcombine.low %v6186_v25, %v6188_v58  ;;  %v5385_v53 = vld [vmem:[#allocation2 + $0x8c] sm:$0xff]  }
 0x11e   : > { %v1285_v50 = vadd.f32 %v1284_v36, %v6282_v6  ;;  %v1714_v33 = vpop.f32.mrf.mxu0 }
 0x11f   : > { %v4944_v21 = vpop.f32.mrf.mxu1  ;;  %5147 = vmatmul.mubr.msk.bf16.gmra.mxu1 %vm798_vm4, %v4672_v63  ;;  %v6325_v29 = vadd.f32 %v1714_v33, %v1268_v27  ;;  %v3903_v27 = vshll.u32 %v5381_v5, 16  ;;  %v5383_v63 = vld [vmem:[#allocation2 + $0x7c] sm:$0xff]   ;;  %v3915_v33 = vshrl.u32 %v5382_v46, 16  ;;  %v5384_v5 = vld [vmem:[#allocation2 + $0x84] sm:$0xff]   ;;  %v4679_v46 = vcombine.low %v6215_v28, %v6220_v8 }
 0x120   : > { %5150 = vmatprep.mubr.msk.bf16.mxu1 %vm798_vm4, %v4673_v39  ;;  %v4971_v51 = vpop.f32.mrf.mxu0  ;;  %v3898_v39 = vsel %vm1482_vm6, %v3893_v43, %v3897_v38  ;;  %v3923_v10 = vshrl.u32 %v5383_v63, 16  ;;  %v3931_v38 = vshrl.u32 %v5384_v5, 16 }
 0x121   : > { %v1295_v23 = vpop.f32.mrf.mxu1  ;;  %v3913_v51 = vrot.slane %v3911_v13, 1 }
 0x122   : > { %v1296_v7 = vadd.f32 %v1295_v23, %v6292_v31  ;;  %v1717_v6 = vpop.f32.mrf.mxu0 }
 0x123   : > { %v4945_v41 = vpop.f32.mrf.mxu1  ;;  %v6333_v54 = vadd.f32 %v1717_v6, %v1271_v49  ;;  %v3905_v49 = vrot.slane %v3903_v27, 1  ;;  %v3917_v56 = vor.u32 %v3915_v33, %v3913_v51 }
 0x124   : > { %v4974_v15 = vpop.f32.mrf.mxu0  ;;  %5177 = vmatmul.mubr.msk.bf16.gmra.mxu0 %vm798_vm4, %v3882_v37 }
 0x125   : > { %v1298_v31 = vpop.f32.mrf.mxu1  ;;  %5180 = vmatprep.mubr.msk.bf16.mxu0 %vm798_vm4, %v3890_v59  ;;  %v3906_v36 = vsel %vm1482_vm6, %v3901_v19, %v3905_v49  ;;  %v3909_v23 = vor.u32 %v3907_v47, %v3905_v49  ;;  %v3927_v59 = vshll.u32 %v5384_v5, 16  ;;  %v4678_v15 = vcombine.low %v6191_v12, %v6212_v61  ;;  %v5389_v5 = vld [vmem:[#allocation2 + $0xa4] ss:$0 sps:$4 sm:$0x11]  }
 0x126   : > { %v1299_v44 = vadd.f32 %v1298_v31, %v6298_v30  ;;  %v1728_v14 = vpop.f32.mrf.mxu0 }
 0x127   : > { %v4948_v55 = vpop.f32.mrf.mxu1  ;;  %5151 = vmatmul.mubr.msk.bf16.gmra.mxu1 %vm798_vm4, %v4674_v32  ;;  %v6341_v3 = vadd.f32 %v1728_v14, %v1282_v18  ;;  %v3919_v18 = vshll.u32 %v5383_v63, 16  ;;  %v3914_v41 = vsel %vm1482_vm6, %v3909_v23, %v3913_v51  ;;  %v3929_v14 = vrot.slane %v3927_v59, 1 }
 0x128   : > { %5154 = vmatprep.mubr.msk.bf16.mxu1 %vm798_vm4, %v4675_v2  ;;  %v4975_v4 = vpop.f32.mrf.mxu0  ;;  %v5386_v55 = vld [vmem:[#allocation2 + $0x94] sm:$0xff]  }
 0x129   : > { %v1309_v9 = vpop.f32.mrf.mxu1  ;;  %v3933_v61 = vor.u32 %v3931_v38, %v3929_v14  ;;  %v5388_v4 = vld [vmem:[#allocation2 + $0x9c] sm:$0xff]   ;;  %v3943_v13 = vshll.u32 %v5386_v55, 16  ;;  %v3947_v33 = vshrl.u32 %v5386_v55, 16 }
 0x12a   : > { %v1310_v22 = vadd.f32 %v1309_v9, %v6193_v24  ;;  %v1731_v30 = vpop.f32.mrf.mxu0 }
 0x12b   : > { %v4949_v57 = vpop.f32.mrf.mxu1  ;;  %v6349_v21 = vadd.f32 %v1731_v30, %v1285_v50  ;;  %v3921_v50 = vrot.slane %v3919_v18, 1  ;;  %v3939_v30 = vshrl.u32 %v5385_v53, 16 }
 0x12c   : > { %v4978_v11 = vpop.f32.mrf.mxu0  ;;  %5181 = vmatmul.mubr.msk.bf16.gmra.mxu0 %vm798_vm4, %v3898_v39 }
 0x12d   : > { %v1312_v24 = vpop.f32.mrf.mxu1  ;;  %5184 = vmatprep.mubr.msk.bf16.mxu0 %vm798_vm4, %v3906_v36  ;;  %v3922_v27 = vsel %vm1482_vm6, %v3917_v56, %v3921_v50  ;;  %v3925_v19 = vor.u32 %v3923_v10, %v3921_v50  ;;  %v3945_v11 = vrot.slane %v3943_v13, 1 }
 0x12e   : > { %v1313_v35 = vadd.f32 %v1312_v24, %v6204_v17  ;;  %v1742_v37 = vpop.f32.mrf.mxu0 }
 0x12f   : > { %v4952_v16 = vpop.f32.mrf.mxu1  ;;  %5155 = vmatmul.mubr.msk.bf16.gmra.mxu1 %vm798_vm4, %v4676_v42  ;;  %v6357_v6 = vadd.f32 %v1742_v37, %v1296_v7  ;;  %v3935_v7 = vshll.u32 %v5385_v53, 16  ;;  %v3930_v39 = vsel %vm1482_vm6, %v3925_v19, %v3929_v14  ;;  %v4680_v42 = vcombine.low %v6222_v48, %v6240_v26 }
 0x130   : > { %5158 = vmatprep.mubr.msk.bf16.mxu1 %vm798_vm4, %v4677_v45  ;;  %v4979_v25 = vpop.f32.mrf.mxu0  ;;  %v3949_v48 = vor.u32 %v3947_v33, %v3945_v11 }
 0x131   : > { %v1323_v58 = vpop.f32.mrf.mxu1  ;;  %v3955_v25 = vshrl.u32 %v5388_v4, 16 }
 0x132   : > { %v1324_v32 = vadd.f32 %v1323_v58, %v6217_v0  ;;  %v1745_v17 = vpop.f32.mrf.mxu0  ;;  %v3959_v58 = vshll.u32 %v5389_v5, 16 }
 0x133   : > { %v4953_v2 = vpop.f32.mrf.mxu1  ;;  %v6365_v31 = vadd.f32 %v1745_v17, %v1299_v44  ;;  %v3937_v44 = vrot.slane %v3935_v7, 1 }
 0x134   : > { %v4982_v43 = vpop.f32.mrf.mxu0  ;;  %5185 = vmatmul.mubr.msk.bf16.gmra.mxu0 %vm798_vm4, %v3914_v41  ;;  %v3961_v2 = vrot.slane %v3959_v58, 1 }
 0x135   : > { %v1326_v0 = vpop.f32.mrf.mxu1  ;;  %5188 = vmatprep.mubr.msk.bf16.mxu0 %vm798_vm4, %v3922_v27  ;;  %v3938_v36 = vsel %vm1482_vm6, %v3933_v61, %v3937_v44  ;;  %v3941_v24 = vor.u32 %v3939_v30, %v3937_v44 }
 0x136   : > { %v1327_v49 = vadd.f32 %v1326_v0, %v6230_v40  ;;  %v1756_v63 = vpop.f32.mrf.mxu0 }
 0x137   : > { %v4956_v12 = vpop.f32.mrf.mxu1  ;;  %5159 = vmatmul.mubr.msk.bf16.gmra.mxu1 %vm798_vm4, %v4678_v15  ;;  %v6373_v9 = vadd.f32 %v1756_v63, %v1310_v22  ;;  %v3951_v22 = vshll.u32 %v5388_v4, 16  ;;  %v3946_v50 = vsel %vm1482_vm6, %v3941_v24, %v3945_v11 }
 0x138   : > { %5162 = vmatprep.mubr.msk.bf16.mxu1 %vm798_vm4, %v4679_v46  ;;  %v4983_v28 = vpop.f32.mrf.mxu0 }
 0x139   : > { %v1337_v8 = vpop.f32.mrf.mxu1  ;;  %v3953_v26 = vrot.slane %v3951_v22, 1 }
 0x13a   : > { %v1338_v47 = vadd.f32 %v1337_v8, %v6243_v62  ;;  %v1759_v40 = vpop.f32.mrf.mxu0 }
 0x13b   : > { %v4957_v57 = vpop.f32.mrf.mxu1  ;;  %v6381_v18 = vadd.f32 %v1759_v40, %v1313_v35 }
 0x13c   : > { %v4986_v45 = vpop.f32.mrf.mxu0  ;;  %5189 = vmatmul.mubr.msk.bf16.gmra.mxu0 %vm798_vm4, %v3930_v39 }
 0x13d   : > { %v1340_v51 = vpop.f32.mrf.mxu1  ;;  %5192 = vmatprep.mubr.msk.bf16.mxu0 %vm798_vm4, %v3938_v36 }
 0x13e   : > { %v1341_v62 = vadd.f32 %v1340_v51, %v6255_v34  ;;  %v1770_v23 = vpop.f32.mrf.mxu0  ;;  %v3954_v34 = vsel %vm1482_vm6, %v3949_v48, %v3953_v26 }
 0x13f   : > { %v4960_v37 = vpop.f32.mrf.mxu1  ;;  %5163 = vmatmul.mubr.msk.bf16.gmra.mxu1 %vm798_vm4, %v4680_v42  ;;  %v6387_v16 = vadd.f32 %v1770_v23, %v1324_v32  ;;  %v3957_v32 = vor.u32 %v3955_v25, %v3953_v26 }
 0x140   : > { %v4987_v35 = vpop.f32.mrf.mxu0 }
 0x141   : > { %v1351_v56 = vpop.f32.mrf.mxu1  ;;  %v3962_v14 = vsel %vm1482_vm6, %v3957_v32, %v3961_v2 }
 0x142   : > { %v1352_v53 = vadd.f32 %v1351_v56, %v6262_v60  ;;  %v1773_v59 = vpop.f32.mrf.mxu0 }
 0x143   : > { %v4961_v41 = vpop.f32.mrf.mxu1  ;;  %v6392_v10 = vadd.f32 %v1773_v59, %v1327_v49 }
 0x144   : > { %v4990_v17 = vpop.f32.mrf.mxu0  ;;  %5193 = vmatmul.mubr.msk.bf16.gmra.mxu0 %vm798_vm4, %v3946_v50 }
 0x145   : > { %v1354_v27 = vpop.f32.mrf.mxu1  ;;  %5196 = vmatprep.mubr.msk.bf16.mxu0 %vm798_vm4, %v3954_v34 }
 0x146   : > { %v1355_v15 = vadd.f32 %v1354_v27, %v6273_v20  ;;  %v1784_v38 = vpop.f32.mrf.mxu0 }
 0x147   : > { %v5000_v60 = vpop.f32.mrf.mxu1  ;;  %v6397_v7 = vadd.f32 %v1784_v38, %v1338_v47 }
 0x148   : > { %v4991_v46 = vpop.f32.mrf.mxu0 }
 0x149   : > { %v2182_v43 = vpop.f32.mrf.mxu1 }
 0x14a   : > { %v2293_v0 = vadd.f32 %v2182_v43, %v6309_v52  ;;  %v1787_v55 = vpop.f32.mrf.mxu0 }
 0x14b   : > { %v5001_v19 = vpop.f32.mrf.mxu1  ;;  %v6401_v49 = vadd.f32 %v1787_v55, %v1341_v62 }
 0x14c   : > { %v4994_v63 = vpop.f32.mrf.mxu0  ;;  %5197 = vmatmul.mubr.msk.bf16.gmra.mxu0 %vm798_vm4, %v3962_v14 }
 0x14d   : > { %v2185_v12 = vpop.f32.mrf.mxu1 }
 0x14e   : > { %v2294_v20 = vadd.f32 %v2185_v12, %v6317_v1  ;;  %v1798_v61 = vpop.f32.mrf.mxu0 }
 0x14f   : > { %v5004_v44 = vpop.f32.mrf.mxu1  ;;  %v6405_v4 = vadd.f32 %v1798_v61, %v1352_v53 }
 0x150   : > { %v4995_v28 = vpop.f32.mrf.mxu0 }
 0x151   : > { %v2196_v8 = vpop.f32.mrf.mxu1 }
 0x152   : > { %v2295_v13 = vadd.f32 %v2196_v8, %v6325_v29  ;;  %v1801_v39 = vpop.f32.mrf.mxu0 }
 0x153   : > { %v5005_v52 = vpop.f32.mrf.mxu1  ;;  %v6408_v47 = vadd.f32 %v1801_v39, %v1355_v15 }
 0x154   : > { %v5034_v30 = vpop.f32.mrf.mxu0 }
 0x155   : > { %v2199_v40 = vpop.f32.mrf.mxu1 }
 0x156   : > { %v2296_v36 = vadd.f32 %v2199_v40, %v6333_v54  ;;  %v2412_v57 = vpop.f32.mrf.mxu0 }
 0x157   : > { %v5008_v42 = vpop.f32.mrf.mxu1  ;;  %v6411_v33 = vadd.f32 %v2412_v57, %v2293_v0 }
 0x158   : > { %v5035_v1 = vpop.f32.mrf.mxu0 }
 0x159   : > { %v2210_v22 = vpop.f32.mrf.mxu1 }
 0x15a   : > { %v2297_v45 = vadd.f32 %v2210_v22, %v6341_v3  ;;  %v2415_v11 = vpop.f32.mrf.mxu0 }
 0x15b   : > { %v5009_v51 = vpop.f32.mrf.mxu1  ;;  %v6414_v24 = vadd.f32 %v2415_v11, %v2294_v20 }
 0x15c   : > { %v5038_v29 = vpop.f32.mrf.mxu0 }
 0x15d   : > { %v2213_v62 = vpop.f32.mrf.mxu1 }
 0x15e   : > { %v2298_v5 = vadd.f32 %v2213_v62, %v6349_v21  ;;  %v2426_v23 = vpop.f32.mrf.mxu0 }
 0x15f   : > { %v5012_v37 = vpop.f32.mrf.mxu1  ;;  %v6417_v48 = vadd.f32 %v2426_v23, %v2295_v13 }
 0x160   : > { %v5039_v54 = vpop.f32.mrf.mxu0 }
 0x161   : > { %v2224_v26 = vpop.f32.mrf.mxu1 }
 0x162   : > { %v2299_v35 = vadd.f32 %v2224_v26, %v6357_v6  ;;  %v2429_v56 = vpop.f32.mrf.mxu0 }
 0x163   : > { %v5013_v50 = vpop.f32.mrf.mxu1  ;;  %v6420_v53 = vadd.f32 %v2429_v56, %v2296_v36 }
 0x164   : > { %v5042_v3 = vpop.f32.mrf.mxu0 }
 0x165   : > { %v2227_v25 = vpop.f32.mrf.mxu1 }
 0x166   : > { %v2300_v58 = vadd.f32 %v2227_v25, %v6365_v31  ;;  %v2440_v59 = vpop.f32.mrf.mxu0 }
 0x167   : > { %v5016_v34 = vpop.f32.mrf.mxu1  ;;  %v6423_v41 = vadd.f32 %v2440_v59, %v2297_v45 }
 0x168   : > { %v5043_v21 = vpop.f32.mrf.mxu0 }
 0x169   : > { %v2238_v17 = vpop.f32.mrf.mxu1 }
 0x16a   : > { %v2301_v27 = vadd.f32 %v2238_v17, %v6373_v9  ;;  %v2443_v32 = vpop.f32.mrf.mxu0 }
 0x16b   : > { %v5017_v2 = vpop.f32.mrf.mxu1  ;;  %v6426_v15 = vadd.f32 %v2443_v32, %v2298_v5 }
 0x16c   : > { %v5046_v6 = vpop.f32.mrf.mxu0 }
 0x16d   : > { %v2241_v38 = vpop.f32.mrf.mxu1 }
 0x16e   : > { %v2302_v60 = vadd.f32 %v2241_v38, %v6381_v18  ;;  %v2454_v46 = vpop.f32.mrf.mxu0 }
 0x16f   : > { %v5020_v43 = vpop.f32.mrf.mxu1  ;;  %v6429_v14 = vadd.f32 %v2454_v46, %v2299_v35 }
 0x170   : > { %v5047_v31 = vpop.f32.mrf.mxu0 }
 0x171   : > { %v2252_v0 = vpop.f32.mrf.mxu1 }
 0x172   : > { %v2303_v55 = vadd.f32 %v2252_v0, %v6387_v16  ;;  %v2457_v19 = vpop.f32.mrf.mxu0 }
 0x173   : > { %v5021_v63 = vpop.f32.mrf.mxu1  ;;  %v6432_v12 = vadd.f32 %v2457_v19, %v2300_v58 }
 0x174   : > { %v5050_v9 = vpop.f32.mrf.mxu0 }
 0x175   : > { %v2255_v20 = vpop.f32.mrf.mxu1 }
 0x176   : > { %v2304_v61 = vadd.f32 %v2255_v20, %v6392_v10  ;;  %v2468_v44 = vpop.f32.mrf.mxu0 }
 0x177   : > { %v5024_v28 = vpop.f32.mrf.mxu1  ;;  %v6435_v8 = vadd.f32 %v2468_v44, %v2301_v27 }
 0x178   : > { %v5051_v18 = vpop.f32.mrf.mxu0 }
 0x179   : > { %v2266_v13 = vpop.f32.mrf.mxu1 }
 0x17a   : > { %v2305_v39 = vadd.f32 %v2266_v13, %v6397_v7  ;;  %v2471_v52 = vpop.f32.mrf.mxu0 }
 0x17b   : > { %v5025_v30 = vpop.f32.mrf.mxu1  ;;  %v6438_v40 = vadd.f32 %v2471_v52, %v2302_v60 }
 0x17c   : > { %v5054_v16 = vpop.f32.mrf.mxu0 }
 0x17d   : > { %v2269_v36 = vpop.f32.mrf.mxu1 }
 0x17e   : > { %v2306_v57 = vadd.f32 %v2269_v36, %v6401_v49  ;;  %v2482_v42 = vpop.f32.mrf.mxu0 }
 0x17f   : > { %v5028_v1 = vpop.f32.mrf.mxu1  ;;  %v6441_v22 = vadd.f32 %v2482_v42, %v2303_v55 }
 0x180   : > { %v5055_v10 = vpop.f32.mrf.mxu0 }
 0x181   : > { %v2280_v45 = vpop.f32.mrf.mxu1 }
 0x182   : > { %v2307_v11 = vadd.f32 %v2280_v45, %v6405_v4  ;;  %v2485_v51 = vpop.f32.mrf.mxu0 }
 0x183   : > { %v5029_v29 = vpop.f32.mrf.mxu1  ;;  %v6444_v62 = vadd.f32 %v2485_v51, %v2304_v61 }
 0x184   : > { %v5058_v7 = vpop.f32.mrf.mxu0 }
 0x185   : > { %v2283_v5 = vpop.f32.mrf.mxu1 }
 0x186   : > { %v2308_v23 = vadd.f32 %v2283_v5, %v6408_v47  ;;  %v2496_v37 = vpop.f32.mrf.mxu0 }
 0x187   : > { %v5068_v54 = vpop.f32.mrf.mxu1  ;;  %v6447_v26 = vadd.f32 %v2496_v37, %v2305_v39 }
 0x188   : > { %v5059_v49 = vpop.f32.mrf.mxu0 }
 0x189   : > { %v2874_v35 = vpop.f32.mrf.mxu1 }
 0x18a   : > { %v6450_v56 = vadd.f32 %v2874_v35, %v6411_v33  ;;  %v2499_v50 = vpop.f32.mrf.mxu0 }
 0x18b   : > { %v5069_v3 = vpop.f32.mrf.mxu1  ;;  %v6452_v4 = vadd.f32 %v2499_v50, %v2306_v57 }
 0x18c   : > { %v5062_v25 = vpop.f32.mrf.mxu0 }
 0x18d   : > { %v2877_v58 = vpop.f32.mrf.mxu1 }
 0x18e   : > { %v6455_v59 = vadd.f32 %v2877_v58, %v6414_v24  ;;  %v2510_v34 = vpop.f32.mrf.mxu0 }
 0x18f   : > { %v5072_v47 = vpop.f32.mrf.mxu1  ;;  %v6457_v21 = vadd.f32 %v2510_v34, %v2307_v11 }
 0x190   : > { %v5063_v17 = vpop.f32.mrf.mxu0 }
 0x191   : > { %v2888_v27 = vpop.f32.mrf.mxu1 }
 0x192   : > { %v6460_v32 = vadd.f32 %v2888_v27, %v6417_v48  ;;  %v2513_v33 = vpop.f32.mrf.mxu0 }
 0x193   : > { %v5073_v2 = vpop.f32.mrf.mxu1  ;;  %v6462_v6 = vadd.f32 %v2513_v33, %v2308_v23 }
 0x194   : > { %v5102_v38 = vpop.f32.mrf.mxu0 }
 0x195   : > { %v2891_v60 = vpop.f32.mrf.mxu1 }
 0x196   : > { %v6465_v46 = vadd.f32 %v2891_v60, %v6420_v53  ;;  %v6467_v24 = vpop.f32.mrf.mxu0 }
 0x197   : > { %v5076_v43 = vpop.f32.mrf.mxu1 }
 0x198   : > { %v5103_v31 = vpop.f32.mrf.mxu0 }
 0x199   : > { %v2902_v0 = vpop.f32.mrf.mxu1 }
 0x19a   : > { %v6470_v55 = vadd.f32 %v2902_v0, %v6423_v41  ;;  %v6472_v19 = vpop.f32.mrf.mxu0 }
 0x19b   : > { %v5077_v48 = vpop.f32.mrf.mxu1 }
 0x19c   : > { %v5106_v63 = vpop.f32.mrf.mxu0 }
 0x19d   : > { %v2905_v9 = vpop.f32.mrf.mxu1 }
 0x19e   : > { %v6475_v20 = vadd.f32 %v2905_v9, %v6426_v15  ;;  %v6477_v61 = vpop.f32.mrf.mxu0 }
 0x19f   : > { %v5080_v53 = vpop.f32.mrf.mxu1 }
 0x1a0   : > { %v5107_v44 = vpop.f32.mrf.mxu0 }
 0x1a1   : > { %v2916_v28 = vpop.f32.mrf.mxu1 }
 0x1a2   : > { %v6480_v18 = vadd.f32 %v2916_v28, %v6429_v14  ;;  %v6482_v13 = vpop.f32.mrf.mxu0 }
 0x1a3   : > { %v5081_v41 = vpop.f32.mrf.mxu1 }
 0x1a4   : > { %v5110_v39 = vpop.f32.mrf.mxu0 }
 0x1a5   : > { %v2919_v52 = vpop.f32.mrf.mxu1 }
 0x1a6   : > { %v6485_v30 = vadd.f32 %v2919_v52, %v6432_v12  ;;  %v6487_v16 = vpop.f32.mrf.mxu0 }
 0x1a7   : > { %v5084_v15 = vpop.f32.mrf.mxu1 }
 0x1a8   : > { %v5111_v36 = vpop.f32.mrf.mxu0 }
 0x1a9   : > { %v2930_v57 = vpop.f32.mrf.mxu1 }
 0x1aa   : > { %v6490_v42 = vadd.f32 %v2930_v57, %v6435_v8  ;;  %v6492_v1 = vpop.f32.mrf.mxu0  ;;  %v3467_v57 = vadd.f32 %v6467_v24, %v6450_v56 }
 0x1ab   : > { %v5085_v14 = vpop.f32.mrf.mxu1 }
 0x1ac   : > { %v5114_v10 = vpop.f32.mrf.mxu0 }
 0x1ad   : > { %v2933_v45 = vpop.f32.mrf.mxu1 }
 0x1ae   : > { %v6495_v11 = vadd.f32 %v2933_v45, %v6438_v40  ;;  %v6497_v51 = vpop.f32.mrf.mxu0 }
 0x1af   : > { %v5088_v12 = vpop.f32.mrf.mxu1 }
 0x1b0   : > { %v5115_v29 = vpop.f32.mrf.mxu0 }
 0x1b1   : > { %v2944_v7 = vpop.f32.mrf.mxu1 }
 0x1b2   : > { %v6500_v5 = vadd.f32 %v2944_v7, %v6441_v22  ;;  %v6502_v23 = vpop.f32.mrf.mxu0  ;;  %v3468_v7 = vadd.f32 %v6472_v19, %v6455_v59 }
 0x1b3   : > { %v5089_v8 = vpop.f32.mrf.mxu1 }
 0x1b4   : > { %v5118_v37 = vpop.f32.mrf.mxu0 }
 0x1b5   : > { %v2947_v54 = vpop.f32.mrf.mxu1 }
 0x1b6   : > { %v6505_v49 = vadd.f32 %v2947_v54, %v6444_v62  ;;  %v6507_v35 = vpop.f32.mrf.mxu0 }
 0x1b7   : > { %v5092_v40 = vpop.f32.mrf.mxu1 }
 0x1b8   : > { %v5119_v50 = vpop.f32.mrf.mxu0 }
 0x1b9   : > { %v2958_v3 = vpop.f32.mrf.mxu1  ;;  %v3469_v50 = vadd.f32 %v6477_v61, %v6460_v32 }
 0x1ba   : > { %v6510_v25 = vadd.f32 %v2958_v3, %v6447_v26  ;;  %v6512_v58 = vpop.f32.mrf.mxu0 }
 0x1bb   : > { %v5093_v22 = vpop.f32.mrf.mxu1 }
 0x1bc   : > { %v5122_v34 = vpop.f32.mrf.mxu0 }
 0x1bd   : > { %v2961_v47 = vpop.f32.mrf.mxu1 }
 0x1be   : > { %v6515_v17 = vadd.f32 %v2961_v47, %v6452_v4  ;;  %v6517_v27 = vpop.f32.mrf.mxu0 }
 0x1bf   : > { %v5096_v62 = vpop.f32.mrf.mxu1 }
 0x1c0   : > { %v5123_v33 = vpop.f32.mrf.mxu0  ;;  %v3470_v62 = vadd.f32 %v6482_v13, %v6465_v46 }
 0x1c1   : > { %v2972_v2 = vpop.f32.mrf.mxu1 }
 0x1c2   : > { %v6520_v38 = vadd.f32 %v2972_v2, %v6457_v21  ;;  %v6522_v60 = vpop.f32.mrf.mxu0 }
 0x1c3   : > { %v5097_v26 = vpop.f32.mrf.mxu1 }
 0x1c4   : > { %v5126_v43 = vpop.f32.mrf.mxu0 }
 0x1c5   : > { %v2975_v31 = vpop.f32.mrf.mxu1 }
 0x1c6   : > { %v6525_v0 = vadd.f32 %v2975_v31, %v6462_v6  ;;  %v6527_v48 = vpop.f32.mrf.mxu0  ;;  %v3471_v31 = vadd.f32 %v6487_v16, %v6470_v55 }
 0x1c7   : > { %v5136_v4 = vpop.f32.mrf.mxu1 }
 0x1c8   : > { %v5127_v63 = vpop.f32.mrf.mxu0 }
 0x1c9   : > { %v3586_v9 = vpop.f32.mrf.mxu1 }
 0x1ca   : > { %v6529_v53 = vpop.f32.mrf.mxu0  ;;  %v3697_v45 = vadd.f32 %v3586_v9, %v3467_v57 }
 0x1cb   : > { %v5137_v44 = vpop.f32.mrf.mxu1 }
 0x1cc   : > { %v5130_v28 = vpop.f32.mrf.mxu0 }
 0x1cd   : > { %v3589_v21 = vpop.f32.mrf.mxu1  ;;  %v3472_v28 = vadd.f32 %v6492_v1, %v6475_v20 }
 0x1ce   : > { %v6531_v41 = vpop.f32.mrf.mxu0  ;;  %v3698_v24 = vadd.f32 %v3589_v21, %v3468_v7 }
 0x1cf   : > { %v5140_v39 = vpop.f32.mrf.mxu1 }
 0x1d0   : > { %v5131_v52 = vpop.f32.mrf.mxu0 }
 0x1d1   : > { %v3600_v15 = vpop.f32.mrf.mxu1 }
 0x1d2   : > { %v6533_v36 = vpop.f32.mrf.mxu0  ;;  %v3699_v47 = vadd.f32 %v3600_v15, %v3469_v50 }
 0x1d3   : > { %v5141_v6 = vpop.f32.mrf.mxu1 }
 0x1d4   : > { %v5170_v14 = vpop.f32.mrf.mxu0  ;;  %v3473_v6 = vadd.f32 %v6497_v51, %v6480_v18 }
 0x1d5   : > { %v3603_v10 = vpop.f32.mrf.mxu1 }
 0x1d6   : > { %v4048_v12 = vpop.f32.mrf.mxu0  ;;  %v3700_v43 = vadd.f32 %v3603_v10, %v3470_v62 }
 0x1d7   : > { %v5144_v29 = vpop.f32.mrf.mxu1  ;;  %v4159_v8 = vadd.f32 %v4048_v12, %v3697_v45  ;;  %v3474_v12 = vadd.f32 %v6502_v23, %v6485_v30 }
 0x1d8   : > { %v5171_v37 = vpop.f32.mrf.mxu0 }
 0x1d9   : > { %v3614_v56 = vpop.f32.mrf.mxu1  ;;  %4176 = vst.msk [vmem:[%s6541_s6] sm:$0xff] %vm4175_vm8, %v4159_v8 }
 0x1da   : > { %v4051_v54 = vpop.f32.mrf.mxu0  ;;  %v3701_v44 = vadd.f32 %v3614_v56, %v3471_v31  ;;  %v3475_v56 = vadd.f32 %v6507_v35, %v6490_v42 }
 0x1db   : > { %v5145_v40 = vpop.f32.mrf.mxu1  ;;  %v4160_v3 = vadd.f32 %v4051_v54, %v3698_v24 }
 0x1dc   : > { %v5174_v22 = vpop.f32.mrf.mxu0 }
 0x1dd   : > { %v3617_v34 = vpop.f32.mrf.mxu1  ;;  %4177 = vst.msk [vmem:[%s6541_s6 + $0x8] sm:$0xff] %vm4175_vm8, %v4160_v3  ;;  %v3476_v3 = vadd.f32 %v6512_v58, %v6495_v11 }
 0x1de   : > { %v4062_v59 = vpop.f32.mrf.mxu0  ;;  %v3702_v15 = vadd.f32 %v3617_v34, %v3472_v28 }
 0x1df   : > { %v5148_v19 = vpop.f32.mrf.mxu1  ;;  %v4161_v33 = vadd.f32 %v4062_v59, %v3699_v47 }
 0x1e0   : > { %v5175_v2 = vpop.f32.mrf.mxu0  ;;  %v3477_v19 = vadd.f32 %v6517_v27, %v6500_v5 }
 0x1e1   : > { %v3628_v26 = vpop.f32.mrf.mxu1  ;;  %4178 = vst.msk [vmem:[%s6541_s6 + $0x10] sm:$0xff] %vm4175_vm8, %v4161_v33 }
 0x1e2   : > { %v4065_v32 = vpop.f32.mrf.mxu0  ;;  %v3703_v45 = vadd.f32 %v3628_v26, %v3473_v6 }
 0x1e3   : > { %v5149_v61 = vpop.f32.mrf.mxu1  ;;  %v4162_v4 = vadd.f32 %v4065_v32, %v3700_v43  ;;  %v3478_v43 = vadd.f32 %v6522_v60, %v6505_v49  ;;  %v3480_v49 = vadd.f32 %v6529_v53, %v6515_v17  ;;  %v3482_v17 = vadd.f32 %v6533_v36, %v6525_v0 }
 0x1e4   : > { %v5178_v63 = vpop.f32.mrf.mxu0 }
 0x1e5   : > { %v3631_v9 = vpop.f32.mrf.mxu1  ;;  %4179 = vst.msk [vmem:[%s6541_s6 + $0x18] sm:$0xff] %vm4175_vm8, %v4162_v4  ;;  %v3479_v63 = vadd.f32 %v6527_v48, %v6510_v25  ;;  %v3481_v25 = vadd.f32 %v6531_v41, %v6520_v38 }
 0x1e6   : > { %v4076_v46 = vpop.f32.mrf.mxu0  ;;  %v3704_v37 = vadd.f32 %v3631_v9, %v3474_v12 }
 0x1e7   : > { %v5152_v13 = vpop.f32.mrf.mxu1  ;;  %v4163_v21 = vadd.f32 %v4076_v46, %v3701_v44 }
 0x1e8   : > { %v5179_v39 = vpop.f32.mrf.mxu0 }
 0x1e9   : > { %v3642_v52 = vpop.f32.mrf.mxu1  ;;  %4180 = vst.msk [vmem:[%s6541_s6 + $0x20] sm:$0xff] %vm4175_vm8, %v4163_v21 }
 0x1ea   : > { %v4079_v55 = vpop.f32.mrf.mxu0  ;;  %v3705_v50 = vadd.f32 %v3642_v52, %v3475_v56 }
 0x1eb   : > { %v5153_v16 = vpop.f32.mrf.mxu1  ;;  %v4164_v57 = vadd.f32 %v4079_v55, %v3702_v15 }
 0x1ec   : > { %v5182_v14 = vpop.f32.mrf.mxu0 }
 0x1ed   : > { %v3645_v10 = vpop.f32.mrf.mxu1  ;;  %4181 = vst.msk [vmem:[%s6541_s6 + $0x28] sm:$0xff] %vm4175_vm8, %v4164_v57 }
 0x1ee   : > { %v4090_v20 = vpop.f32.mrf.mxu0  ;;  %v3706_v59 = vadd.f32 %v3645_v10, %v3476_v3 }
 0x1ef   : > { %v5156_v1 = vpop.f32.mrf.mxu1  ;;  %v4165_v29 = vadd.f32 %v4090_v20, %v3703_v45 }
 0x1f0   : > { %v5183_v7 = vpop.f32.mrf.mxu0 }
 0x1f1   : > { %v3656_v8 = vpop.f32.mrf.mxu1  ;;  %4182 = vst.msk [vmem:[%s6541_s6 + $0x30] sm:$0xff] %vm4175_vm8, %v4165_v29 }
 0x1f2   : > { %v4093_v18 = vpop.f32.mrf.mxu0  ;;  %v3707_v26 = vadd.f32 %v3656_v8, %v3477_v19 }
 0x1f3   : > { %v5157_v51 = vpop.f32.mrf.mxu1  ;;  %v4166_v24 = vadd.f32 %v4093_v18, %v3704_v37 }
 0x1f4   : > { %v5186_v54 = vpop.f32.mrf.mxu0 }
 0x1f5   : > { %v3659_v40 = vpop.f32.mrf.mxu1  ;;  %4183 = vst.msk [vmem:[%s6541_s6 + $0x38] sm:$0xff] %vm4175_vm8, %v4166_v24 }
 0x1f6   : > { %v4104_v30 = vpop.f32.mrf.mxu0  ;;  %v3708_v4 = vadd.f32 %v3659_v40, %v3478_v43 }
 0x1f7   : > { %v5160_v23 = vpop.f32.mrf.mxu1  ;;  %v4167_v22 = vadd.f32 %v4104_v30, %v3705_v50 }
 0x1f8   : > { %v5187_v34 = vpop.f32.mrf.mxu0 }
 0x1f9   : > { %v3670_v47 = vpop.f32.mrf.mxu1  ;;  %4184 = vst.msk [vmem:[%s6541_s6 + $0x40] sm:$0xff] %vm4175_vm8, %v4167_v22 }
 0x1fa   : > { %v4107_v42 = vpop.f32.mrf.mxu0  ;;  %v3709_v46 = vadd.f32 %v3670_v47, %v3479_v63 }
 0x1fb   : > { %v5161_v35 = vpop.f32.mrf.mxu1  ;;  %v4168_v62 = vadd.f32 %v4107_v42, %v3706_v59 }
 0x1fc   : > { %v5190_v33 = vpop.f32.mrf.mxu0 }
 0x1fd   : > { %v3673_v2 = vpop.f32.mrf.mxu1  ;;  %4185 = vst.msk [vmem:[%s6541_s6 + $0x48] sm:$0xff] %vm4175_vm8, %v4168_v62 }
 0x1fe   : > { %v4118_v11 = vpop.f32.mrf.mxu0  ;;  %v3710_v21 = vadd.f32 %v3673_v2, %v3480_v49 }
 0x1ff   : > { %v5164_v58 = vpop.f32.mrf.mxu1  ;;  %v4169_v32 = vadd.f32 %v4118_v11, %v3707_v26 }
 0x200   : > { %v5191_v61 = vpop.f32.mrf.mxu0 }
 0x201   : > { %v3684_v31 = vpop.f32.mrf.mxu1  ;;  %4186 = vst.msk [vmem:[%s6541_s6 + $0x50] sm:$0xff] %vm4175_vm8, %v4169_v32 }
 0x202   : > { %v4121_v5 = vpop.f32.mrf.mxu0  ;;  %v3711_v15 = vadd.f32 %v3684_v31, %v3481_v25 }
 0x203   : > { %v5165_v27 = vpop.f32.mrf.mxu1  ;;  %v4170_v9 = vadd.f32 %v4121_v5, %v3708_v4 }
 0x204   : > { %v5194_v44 = vpop.f32.mrf.mxu0 }
 0x205   : > { %4187 = vst.msk [vmem:[%s6541_s6 + $0x58] sm:$0xff] %vm4175_vm8, %v4170_v9  ;;  %v3687_v55 = vpop.f32.mrf.mxu1 }
 0x206   : > { %v4132_v13 = vpop.f32.mrf.mxu0  ;;  %v3712_v57 = vadd.f32 %v3687_v55, %v3482_v17 }
 0x207   : > { %v4171_v60 = vadd.f32 %v4132_v13, %v3709_v46 }
 0x208   : > { %v5195_v28 = vpop.f32.mrf.mxu0 }
 0x209   : > { %4188 = vst.msk [vmem:[%s6541_s6 + $0x60] sm:$0xff] %vm4175_vm8, %v4171_v60 }
 0x20a   : > { %v4135_v39 = vpop.f32.mrf.mxu0 }
 0x20b   : > { %v4172_v48 = vadd.f32 %v4135_v39, %v3710_v21 }
 0x20c   : > { %v5198_v52 = vpop.f32.mrf.mxu0 }
 0x20d   : > { %4189 = vst.msk [vmem:[%s6541_s6 + $0x68] sm:$0xff] %vm4175_vm8, %v4172_v48 }
 0x20e   : > { %v4146_v16 = vpop.f32.mrf.mxu0 }
 0x20f   : > { %v4173_v53 = vadd.f32 %v4146_v16, %v3711_v15 }
 0x210   : > { %v5199_v6 = vpop.f32.mrf.mxu0 }
 0x211   : > { %4190 = vst.msk [vmem:[%s6541_s6 + $0x70] sm:$0xff] %vm4175_vm8, %v4173_v53 }
 0x212   : > { %v4149_v14 = vpop.f32.mrf.mxu0 }
 0x213   : > { %v4174_v10 = vadd.f32 %v4149_v14, %v3712_v57 }
 0x215   : > { %4191 = vst.msk [vmem:[%s6541_s6 + $0x78] sm:$0xff] %vm4175_vm8, %v4174_v10 }
 0x216 PF: > { %s14_s19 = sadd.s32 1, %s5428_s19   ;;  %s6630_s15 = smov %s5420_s17 }
 0x217   : > { %p11_p12 = scmp.ge.s32.totalorder %s14_s19, 6   ;;  %s6631_s16 = smov %s5424_s18 }
 0x218   : > { %s6632_s17 = smov %s6635_s20  ;;  %s6633_s18 = smov %s6639_s21 }
 0x219   :  { %13 = sbr.rel (!%p11_p12) target bundleno = 3 (0x3), region = 80 }

</bundles_post_ra>
